<compile_context>
chip_gen: v7x
topology: tpu7x:2x2x1
jax: 0.10.0
libtpu: 0.0.40
codegen_flags: <defaults>
</compile_context>

<pallas_src>
import numpy as np
import jax
import jax.numpy as jnp
from jax import lax
from jax.experimental import pallas as pl
from jax.experimental.pallas import tpu as pltpu

NV = 778          # MANO vertex count
NJ = 16           # MANO skeleton joints
NCOMPS = 45       # PCA pose components
NPOSE = 9 * 15    # 135 pose-blendshape drivers
NPACK = 10 + NPOSE + 1   # 146 = betas | pose_map | constant-1 row
VPAD = 896        # 7 * 128, lane-aligned padded vertex count
F32 = jnp.float32
BF16 = jnp.bfloat16


def _round_up(x, m):
    return (x + m - 1) // m * m


# ----------------------------- fused Pallas kernel -----------------------------

def _mano_kernel(packed_ref, akt_ref, blend_ref, wt_ref, verts_ref):
    # Blendshapes: v_posed[b, c*VPAD + v] = [betas|pose_map|1] @ [SD;PD;vt]
    # (bf16 x bf16 -> f32 accumulation, single native MXU pass)
    vp = jnp.dot(packed_ref[...], blend_ref[...],
                 preferred_element_type=F32)                 # [BT, 3*VPAD] f32
    vx = vp[:, 0 * VPAD:1 * VPAD]                            # [BT, VPAD]
    vy = vp[:, 1 * VPAD:2 * VPAD]
    vz = vp[:, 2 * VPAD:3 * VPAD]

    # Linear blend skinning. akt[k, r, b, j] = A[b, joint=j, row=r, col=k]
    # t_{k,r}[b, v] = sum_j akt[k, r, b, j] * W[j, v]
    akt = akt_ref[...]                                       # [4, 3, BT, NJ]
    wt = wt_ref[...]                                         # [NJ, VPAD]
    for r in range(3):
        acc = jnp.dot(akt[3, r], wt, preferred_element_type=F32)       # translation
        acc = acc + jnp.dot(akt[0, r], wt, preferred_element_type=F32) * vx
        acc = acc + jnp.dot(akt[1, r], wt, preferred_element_type=F32) * vy
        acc = acc + jnp.dot(akt[2, r], wt, preferred_element_type=F32) * vz
        verts_ref[r] = acc                                   # dense [BT, VPAD] store


def mano_fused(packed, akt, blend_bf16, wt):
    """packed [B,146] bf16, akt [4,3,B,16] f32, blend [146,3*VPAD] bf16,
       wt [16,VPAD] f32  ->  verts [3, B, VPAD] f32"""
    B = packed.shape[0]
    BT = min(128, _round_up(max(B, 1), 8))
    B_pad = _round_up(B, BT)
    if B_pad != B:
        packed = jnp.pad(packed, ((0, B_pad - B), (0, 0)))
        akt = jnp.pad(akt, ((0, 0), (0, 0), (0, B_pad - B), (0, 0)))

    verts3 = pl.pallas_call(
        _mano_kernel,
        grid=(B_pad // BT,),
        in_specs=[
            pl.BlockSpec((BT, NPACK), lambda i: (i, 0)),
            pl.BlockSpec((4, 3, BT, NJ), lambda i: (0, 0, i, 0)),
            pl.BlockSpec((NPACK, 3 * VPAD), lambda i: (0, 0)),
            pl.BlockSpec((NJ, VPAD), lambda i: (0, 0)),
        ],
        out_specs=pl.BlockSpec((3, BT, VPAD), lambda i: (0, i, 0)),
        out_shape=jax.ShapeDtypeStruct((3, B_pad, VPAD), F32),
        compiler_params=pltpu.CompilerParams(
            dimension_semantics=("parallel",),
            vmem_limit_bytes=32 * 1024 * 1024),
    )(packed, akt, blend_bf16, wt)
    return verts3[:, :B]


# ----------------------------- JAX glue math -----------------------------

def _quat2mat(quat):
    nq = quat / jnp.linalg.norm(quat, axis=1, keepdims=True)
    w, x, y, z = nq[:, 0], nq[:, 1], nq[:, 2], nq[:, 3]
    w2, x2, y2, z2 = w * w, x * x, y * y, z * z
    wx, wy, wz = w * x, w * y, w * z
    xy, xz, yz = x * y, x * z, y * z
    rot = jnp.stack([w2 + x2 - y2 - z2, 2 * xy - 2 * wz, 2 * wy + 2 * xz,
                     2 * wz + 2 * xy, w2 - x2 + y2 - z2, 2 * yz - 2 * wx,
                     2 * xz - 2 * wy, 2 * wx + 2 * yz, w2 - x2 - y2 + z2],
                    axis=1)
    return rot.reshape(-1, 3, 3)


def _batch_rodrigues(axisang):
    # TODO(synk): robust_rot=True rotation projection variant not replicated;
    #             standard manopth quaternion Rodrigues route used.
    angle = jnp.linalg.norm(axisang + 1e-8, axis=1, keepdims=True)
    normalized = axisang / angle
    half = angle * 0.5
    quat = jnp.concatenate([jnp.cos(half), jnp.sin(half) * normalized], axis=1)
    return _quat2mat(quat)


def _with_zeros(m):  # [..., 3, 4] -> [..., 4, 4]
    pad = jnp.broadcast_to(jnp.array([0., 0., 0., 1.], F32), m.shape[:-2] + (1, 4))
    return jnp.concatenate([m, pad], axis=-2)


# ----------------------------- MANO layer -----------------------------

class MANOLayerPallas:
    def __init__(self, side, betas):
        assert side in ('right', 'left')
        self._side = side
        self._tip_idxs = [745, 317, 444, 556, 673] if side == 'right' \
            else [745, 317, 445, 556, 673]

        # deterministic synthetic MANO parameters (shapes match the real model)
        ks = jax.random.split(jax.random.PRNGKey(42), 8)
        shapedirs = 0.01 * jax.random.normal(ks[0], (NV, 3, 10), F32)       # [778,3,10]
        posedirs = 0.01 * jax.random.normal(ks[1], (NV, 3, NPOSE), F32)     # [778,3,135]
        v_template = 0.1 * jax.random.normal(ks[2], (NV, 3), F32)           # [778,3]
        jr = jax.random.uniform(ks[3], (NJ, NV), F32, 1e-3, 1.0)
        J_regressor = jr / jr.sum(axis=1, keepdims=True)                    # [16,778]
        w = jax.random.uniform(ks[4], (NV, NJ), F32, 1e-3, 1.0)
        weights = w / w.sum(axis=1, keepdims=True)                          # [778,16]
        self.selected_comps = 0.1 * jax.random.normal(ks[5], (NCOMPS, NCOMPS), F32)
        self.hands_mean = jnp.zeros((1, NCOMPS), F32)   # flat_hand_mean=True

        self.b = jnp.asarray(betas, F32)[None, :]       # [1, 10]

        # ---- fused, lane-aligned blendshape matrix [betas|pose_map|1] -> v_posed ----
        sd_t = jnp.pad(jnp.transpose(shapedirs, (2, 1, 0)),
                       ((0, 0), (0, 0), (0, VPAD - NV)))                    # [10,3,VPAD]
        SD2 = sd_t.reshape(10, 3 * VPAD)
        pd_t = jnp.pad(jnp.transpose(posedirs, (2, 1, 0)),
                       ((0, 0), (0, 0), (0, VPAD - NV)))                    # [135,3,VPAD]
        PD2 = pd_t.reshape(NPOSE, 3 * VPAD)
        vt_flat = jnp.pad(v_template.T, ((0, 0), (0, VPAD - NV))).reshape(1, 3 * VPAD)
        self.BLEND = jnp.concatenate([SD2, PD2, vt_flat], axis=0).astype(BF16)  # [146,3*VPAD]

        # ---- joint regressor folded through the shape blendshapes ----
        # joints_flat[b, j*3+c] = betas @ JSD + JT  (tiny plain-JAX GEMV)
        self.JSD = jnp.einsum('jv,vck->kjc', J_regressor, shapedirs).reshape(10, NJ * 3)
        self.JT = (J_regressor @ v_template).reshape(1, NJ * 3)

        # skinning weights, transposed + lane padded (f32; only 57 KB)
        self.WT = jnp.pad(weights.T, ((0, 0), (0, VPAD - NV)))              # [16, VPAD]

        # root_trans buffer (unused in forward, kept for fidelity with __init__)
        v0 = jnp.einsum('vck,k->vc', shapedirs, self.b[0]) + v_template
        self.root_trans = J_regressor[0] @ v0                               # [3]

    # pure-JAX reference of the fused kernel (same bf16-quantized operands)
    def _fused_ref(self, packed, akt):
        vp = packed.astype(F32) @ self.BLEND.astype(F32)                    # [B, 3*VPAD]
        vx = vp[:, 0 * VPAD:1 * VPAD]
        vy = vp[:, 1 * VPAD:2 * VPAD]
        vz = vp[:, 2 * VPAD:3 * VPAD]
        t = jnp.einsum('krbj,jv->krbv', akt, self.WT)                       # [4,3,B,VPAD]
        return t[3] + t[0] * vx + t[1] * vy + t[2] * vz                     # [3,B,VPAD]

    def forward(self, p, t, use_pallas=True):
        B = p.shape[0]
        betas = jnp.broadcast_to(self.b, (B, 10))

        # PCA pose -> full axis-angle pose
        full_hand = p[:, 3:] @ self.selected_comps
        full_pose = jnp.concatenate([p[:, :3], self.hands_mean + full_hand], axis=1)

        rot = _batch_rodrigues(full_pose.reshape(-1, 3)).reshape(B, NJ, 3, 3)
        pose_map = (rot - jnp.eye(3, dtype=F32)).reshape(B, NJ * 9)[:, 9:]  # [B,135]
        root_rot = rot[:, 0]
        rot_rest = rot[:, 1:]                                               # [B,15,3,3]

        # joints from the folded regressor (plain JAX, 10x48 GEMV)
        th_j = (betas @ self.JSD + self.JT).reshape(B, NJ, 3)

        # ---- kinematic chain (small, plain JAX) ----
        root_j = th_j[:, 0, :].reshape(B, 3, 1)
        root_tf = _with_zeros(jnp.concatenate([root_rot, root_j], axis=2))  # [B,4,4]
        l1, l2, l3 = [1, 4, 7, 10, 13], [2, 5, 8, 11, 14], [3, 6, 9, 12, 15]
        lev1_rots = rot_rest[:, [i - 1 for i in l1]]
        lev2_rots = rot_rest[:, [i - 1 for i in l2]]
        lev3_rots = rot_rest[:, [i - 1 for i in l3]]
        lev1_j, lev2_j, lev3_j = th_j[:, l1], th_j[:, l2], th_j[:, l3]

        lev1_rel = _with_zeros(jnp.concatenate(
            [lev1_rots, (lev1_j - jnp.transpose(root_j, (0, 2, 1)))[..., None]], axis=3))
        lev1_flt = jnp.einsum('bij,bnjk->bnik', root_tf, lev1_rel)
        lev2_rel = _with_zeros(jnp.concatenate(
            [lev2_rots, (lev2_j - lev1_j)[..., None]], axis=3))
        lev2_flt = jnp.einsum('bnij,bnjk->bnik', lev1_flt, lev2_rel)
        lev3_rel = _with_zeros(jnp.concatenate(
            [lev3_rots, (lev3_j - lev2_j)[..., None]], axis=3))
        lev3_flt = jnp.einsum('bnij,bnjk->bnik', lev2_flt, lev3_rel)

        all_tf = jnp.concatenate([root_tf[:, None], lev1_flt, lev2_flt, lev3_flt], axis=1)
        reorder = [0, 1, 6, 11, 2, 7, 12, 3, 8, 13, 4, 9, 14, 5, 10, 15]
        th_results = all_tf[:, reorder]                                     # [B,16,4,4]

        joint_js = jnp.concatenate([th_j, jnp.zeros((B, NJ, 1), F32)], axis=2)
        tmp2 = jnp.einsum('bjrc,bjc->bjr', th_results, joint_js)
        A = th_results - jnp.concatenate(
            [jnp.zeros((B, NJ, 4, 3), F32), tmp2[..., None]], axis=3)       # [B,16,4,4]
        # AKT[k, r, b, j] = A[b, j, r, k]  (rows 0..2 only) -> MXU-friendly layout
        AKT = jnp.transpose(A[:, :, :3, :], (3, 2, 0, 1))                   # [4,3,B,16]

        # packed blendshape driver (bf16 for native single-pass MXU matmul)
        packed = jnp.concatenate(
            [betas, pose_map, jnp.ones((B, 1), F32)], axis=1).astype(BF16)  # [B,146]

        # ---- single fused Pallas kernel: blendshapes + LBS ----
        if use_pallas:
            verts3 = mano_fused(packed, AKT, self.BLEND, self.WT)           # [3,B,VPAD]
        else:
            verts3 = self._fused_ref(packed, AKT)

        th_verts = jnp.transpose(verts3, (1, 2, 0))[:, :NV, :]              # [B,778,3]

        th_jtr = th_results[:, :, :3, 3]                                    # [B,16,3]
        tips = th_verts[:, self._tip_idxs]
        th_jtr = jnp.concatenate([th_jtr, tips], axis=1)                    # [B,21,3]
        jt_order = [0, 13, 14, 15, 16, 1, 2, 3, 17, 4, 5, 6, 18,
                    10, 11, 12, 19, 7, 8, 9, 20]
        th_jtr = th_jtr[:, jt_order]

        # manopth uses a whole-batch norm(trans)==0 test -> center at joint 0,
        # else add trans (matches upstream global-check semantics).
        trans_is_zero = jnp.linalg.norm(t) == 0
        center = th_jtr[:, 0:1]
        th_jtr = jnp.where(trans_is_zero, th_jtr - center, th_jtr + t[:, None, :])
        th_verts = jnp.where(trans_is_zero, th_verts - center, th_verts + t[:, None, :])

        # manopth multiplies by 1000 (mm) and MANOLayer divides by 1000 -> identity; omitted.
        # TODO(synk): vertex_normals property (scatter-add over faces) not implemented.
        return th_verts, th_jtr


# ----------------------------- demo / test -----------------------------

if __name__ == "__main__":
    B = 2
    key = jax.random.PRNGKey(0)
    kp, kt = jax.random.split(key)
    betas_np = np.linspace(-0.5, 0.5, 10).astype(np.float32)

    layer = MANOLayerPallas('right', betas_np)
    p = 0.1 * jax.random.normal(kp, (B, 48), F32)
    t = 0.1 * jax.random.normal(kt, (B, 3), F32)

    v, j = layer.forward(p, t, use_pallas=True)
    v = jax.block_until_ready(v)
    j = jax.block_until_ready(j)
    assert v.shape == (B, NV, 3) and j.shape == (B, 21, 3)

    v_ref, j_ref = layer.forward(p, t, use_pallas=False)
    np.testing.assert_allclose(np.asarray(v), np.asarray(v_ref), rtol=2e-3, atol=2e-3)
    np.testing.assert_allclose(np.asarray(j), np.asarray(j_ref), rtol=2e-3, atol=2e-3)

    print("KERNEL_OK")
</pallas_src>

<mosaic_0001>
module attributes {stable_mosaic.version = 11 : i64} {
  func.func @_mano_kernel(%arg0: i32, %arg1: memref<8x146xbf16, #tpu.memory_space<vmem>>, %arg2: memref<4x3x8x16xf32, #tpu.memory_space<vmem>>, %arg3: memref<146x2688xbf16, #tpu.memory_space<vmem>>, %arg4: memref<16x896xf32, #tpu.memory_space<vmem>>, %arg5: memref<3x8x896xf32, #tpu.memory_space<vmem>>) attributes {dimension_semantics = [#tpu.dimension_semantics<parallel>], iteration_bounds = array<i64: 1>, scalar_prefetch = 0 : i64, scratch_operands = 0 : i64, tpu.core_type = #tpu.core_type<tc>, window_params = [{transform_indices = @transform_0, window_bounds = array<i64: 8, 146>}, {transform_indices = @transform_1, window_bounds = array<i64: 4, 3, 8, 16>}, {pipeline_mode = #tpu.pipeline_mode<synchronous>, transform_indices = @transform_2, window_bounds = array<i64: 146, 2688>}, {pipeline_mode = #tpu.pipeline_mode<synchronous>, transform_indices = @transform_3, window_bounds = array<i64: 16, 896>}, {transform_indices = @transform_4, window_bounds = array<i64: 3, 8, 896>}]} {
    %c0 = arith.constant 0 : index
    %c0_0 = arith.constant 0 : index
    %0 = vector.load %arg1[%c0, %c0_0] : memref<8x146xbf16, #tpu.memory_space<vmem>>, vector<8x146xbf16>
    %c0_1 = arith.constant 0 : index
    %c0_2 = arith.constant 0 : index
    %1 = vector.load %arg3[%c0_1, %c0_2] : memref<146x2688xbf16, #tpu.memory_space<vmem>>, vector<146x2688xbf16>
    %cst = arith.constant dense<0.000000e+00> : vector<8x2688xf32>
    %2 = tpu.matmul %0, %1, %cst {dimension_numbers = #tpu.dot_dimension_numbers<[1], [0], [0], [1], [0, 0, 1, 1], [], []>} : vector<8x146xbf16>, vector<146x2688xbf16>, vector<8x2688xf32> -> vector<8x2688xf32>
    %3 = vector.extract_strided_slice %2 {offsets = [0, 0], sizes = [8, 896], strides = [1, 1]} : vector<8x2688xf32> to vector<8x896xf32>
    %4 = vector.extract_strided_slice %2 {offsets = [0, 896], sizes = [8, 896], strides = [1, 1]} : vector<8x2688xf32> to vector<8x896xf32>
    %5 = vector.extract_strided_slice %2 {offsets = [0, 1792], sizes = [8, 896], strides = [1, 1]} : vector<8x2688xf32> to vector<8x896xf32>
    %c0_3 = arith.constant 0 : index
    %c0_4 = arith.constant 0 : index
    %c0_5 = arith.constant 0 : index
    %c0_6 = arith.constant 0 : index
    %6 = vector.load %arg2[%c0_3, %c0_4, %c0_5, %c0_6] : memref<4x3x8x16xf32, #tpu.memory_space<vmem>>, vector<4x3x8x16xf32>
    %c0_7 = arith.constant 0 : index
    %c0_8 = arith.constant 0 : index
    %7 = vector.load %arg4[%c0_7, %c0_8] : memref<16x896xf32, #tpu.memory_space<vmem>>, vector<16x896xf32>
    %8 = vector.extract_strided_slice %6 {offsets = [3, 0, 0, 0], sizes = [1, 1, 8, 16], strides = [1, 1, 1, 1]} : vector<4x3x8x16xf32> to vector<1x1x8x16xf32>
    %9 = vector.shape_cast %8 : vector<1x1x8x16xf32> to vector<8x16xf32>
    %cst_9 = arith.constant dense<0.000000e+00> : vector<8x896xf32>
    %10 = tpu.matmul %9, %7, %cst_9 {dimension_numbers = #tpu.dot_dimension_numbers<[1], [0], [0], [1], [0, 0, 1, 1], [], []>} : vector<8x16xf32>, vector<16x896xf32>, vector<8x896xf32> -> vector<8x896xf32>
    %11 = vector.extract_strided_slice %6 {offsets = [0, 0, 0, 0], sizes = [1, 1, 8, 16], strides = [1, 1, 1, 1]} : vector<4x3x8x16xf32> to vector<1x1x8x16xf32>
    %12 = vector.shape_cast %11 : vector<1x1x8x16xf32> to vector<8x16xf32>
    %cst_10 = arith.constant dense<0.000000e+00> : vector<8x896xf32>
    %13 = tpu.matmul %12, %7, %cst_10 {dimension_numbers = #tpu.dot_dimension_numbers<[1], [0], [0], [1], [0, 0, 1, 1], [], []>} : vector<8x16xf32>, vector<16x896xf32>, vector<8x896xf32> -> vector<8x896xf32>
    %14 = arith.mulf %13, %3 : vector<8x896xf32>
    %15 = arith.addf %10, %14 : vector<8x896xf32>
    %16 = vector.extract_strided_slice %6 {offsets = [1, 0, 0, 0], sizes = [1, 1, 8, 16], strides = [1, 1, 1, 1]} : vector<4x3x8x16xf32> to vector<1x1x8x16xf32>
    %17 = vector.shape_cast %16 : vector<1x1x8x16xf32> to vector<8x16xf32>
    %cst_11 = arith.constant dense<0.000000e+00> : vector<8x896xf32>
    %18 = tpu.matmul %17, %7, %cst_11 {dimension_numbers = #tpu.dot_dimension_numbers<[1], [0], [0], [1], [0, 0, 1, 1], [], []>} : vector<8x16xf32>, vector<16x896xf32>, vector<8x896xf32> -> vector<8x896xf32>
    %19 = arith.mulf %18, %4 : vector<8x896xf32>
    %20 = arith.addf %15, %19 : vector<8x896xf32>
    %21 = vector.extract_strided_slice %6 {offsets = [2, 0, 0, 0], sizes = [1, 1, 8, 16], strides = [1, 1, 1, 1]} : vector<4x3x8x16xf32> to vector<1x1x8x16xf32>
    %22 = vector.shape_cast %21 : vector<1x1x8x16xf32> to vector<8x16xf32>
    %cst_12 = arith.constant dense<0.000000e+00> : vector<8x896xf32>
    %23 = tpu.matmul %22, %7, %cst_12 {dimension_numbers = #tpu.dot_dimension_numbers<[1], [0], [0], [1], [0, 0, 1, 1], [], []>} : vector<8x16xf32>, vector<16x896xf32>, vector<8x896xf32> -> vector<8x896xf32>
    %24 = arith.mulf %23, %5 : vector<8x896xf32>
    %25 = arith.addf %20, %24 : vector<8x896xf32>
    %c0_13 = arith.constant 0 : index
    %c0_14 = arith.constant 0 : index
    %c0_15 = arith.constant 0 : index
    %26 = vector.load %arg5[%c0_13, %c0_14, %c0_15] : memref<3x8x896xf32, #tpu.memory_space<vmem>>, vector<1x8x896xf32>
    %27 = vector.shape_cast %26 : vector<1x8x896xf32> to vector<8x896xf32>
    %28 = vector.shape_cast %25 : vector<8x896xf32> to vector<1x8x896xf32>
    tpu.vector_store %arg5[%c0_13, %c0_14, %c0_15], %28 {strides = array<i32>} : memref<3x8x896xf32, #tpu.memory_space<vmem>>, vector<1x8x896xf32>,
    %29 = vector.extract_strided_slice %6 {offsets = [3, 1, 0, 0], sizes = [1, 1, 8, 16], strides = [1, 1, 1, 1]} : vector<4x3x8x16xf32> to vector<1x1x8x16xf32>
    %30 = vector.shape_cast %29 : vector<1x1x8x16xf32> to vector<8x16xf32>
    %cst_16 = arith.constant dense<0.000000e+00> : vector<8x896xf32>
    %31 = tpu.matmul %30, %7, %cst_16 {dimension_numbers = #tpu.dot_dimension_numbers<[1], [0], [0], [1], [0, 0, 1, 1], [], []>} : vector<8x16xf32>, vector<16x896xf32>, vector<8x896xf32> -> vector<8x896xf32>
    %32 = vector.extract_strided_slice %6 {offsets = [0, 1, 0, 0], sizes = [1, 1, 8, 16], strides = [1, 1, 1, 1]} : vector<4x3x8x16xf32> to vector<1x1x8x16xf32>
    %33 = vector.shape_cast %32 : vector<1x1x8x16xf32> to vector<8x16xf32>
    %cst_17 = arith.constant dense<0.000000e+00> : vector<8x896xf32>
    %34 = tpu.matmul %33, %7, %cst_17 {dimension_numbers = #tpu.dot_dimension_numbers<[1], [0], [0], [1], [0, 0, 1, 1], [], []>} : vector<8x16xf32>, vector<16x896xf32>, vector<8x896xf32> -> vector<8x896xf32>
    %35 = arith.mulf %34, %3 : vector<8x896xf32>
    %36 = arith.addf %31, %35 : vector<8x896xf32>
    %37 = vector.extract_strided_slice %6 {offsets = [1, 1, 0, 0], sizes = [1, 1, 8, 16], strides = [1, 1, 1, 1]} : vector<4x3x8x16xf32> to vector<1x1x8x16xf32>
    %38 = vector.shape_cast %37 : vector<1x1x8x16xf32> to vector<8x16xf32>
    %cst_18 = arith.constant dense<0.000000e+00> : vector<8x896xf32>
    %39 = tpu.matmul %38, %7, %cst_18 {dimension_numbers = #tpu.dot_dimension_numbers<[1], [0], [0], [1], [0, 0, 1, 1], [], []>} : vector<8x16xf32>, vector<16x896xf32>, vector<8x896xf32> -> vector<8x896xf32>
    %40 = arith.mulf %39, %4 : vector<8x896xf32>
    %41 = arith.addf %36, %40 : vector<8x896xf32>
    %42 = vector.extract_strided_slice %6 {offsets = [2, 1, 0, 0], sizes = [1, 1, 8, 16], strides = [1, 1, 1, 1]} : vector<4x3x8x16xf32> to vector<1x1x8x16xf32>
    %43 = vector.shape_cast %42 : vector<1x1x8x16xf32> to vector<8x16xf32>
    %cst_19 = arith.constant dense<0.000000e+00> : vector<8x896xf32>
    %44 = tpu.matmul %43, %7, %cst_19 {dimension_numbers = #tpu.dot_dimension_numbers<[1], [0], [0], [1], [0, 0, 1, 1], [], []>} : vector<8x16xf32>, vector<16x896xf32>, vector<8x896xf32> -> vector<8x896xf32>
    %45 = arith.mulf %44, %5 : vector<8x896xf32>
    %46 = arith.addf %41, %45 : vector<8x896xf32>
    %c1 = arith.constant 1 : index
    %c0_20 = arith.constant 0 : index
    %c0_21 = arith.constant 0 : index
    %47 = vector.load %arg5[%c1, %c0_20, %c0_21] : memref<3x8x896xf32, #tpu.memory_space<vmem>>, vector<1x8x896xf32>
    %48 = vector.shape_cast %47 : vector<1x8x896xf32> to vector<8x896xf32>
    %49 = vector.shape_cast %46 : vector<8x896xf32> to vector<1x8x896xf32>
    tpu.vector_store %arg5[%c1, %c0_20, %c0_21], %49 {strides = array<i32>} : memref<3x8x896xf32, #tpu.memory_space<vmem>>, vector<1x8x896xf32>,
    %50 = vector.extract_strided_slice %6 {offsets = [3, 2, 0, 0], sizes = [1, 1, 8, 16], strides = [1, 1, 1, 1]} : vector<4x3x8x16xf32> to vector<1x1x8x16xf32>
    %51 = vector.shape_cast %50 : vector<1x1x8x16xf32> to vector<8x16xf32>
    %cst_22 = arith.constant dense<0.000000e+00> : vector<8x896xf32>
    %52 = tpu.matmul %51, %7, %cst_22 {dimension_numbers = #tpu.dot_dimension_numbers<[1], [0], [0], [1], [0, 0, 1, 1], [], []>} : vector<8x16xf32>, vector<16x896xf32>, vector<8x896xf32> -> vector<8x896xf32>
    %53 = vector.extract_strided_slice %6 {offsets = [0, 2, 0, 0], sizes = [1, 1, 8, 16], strides = [1, 1, 1, 1]} : vector<4x3x8x16xf32> to vector<1x1x8x16xf32>
    %54 = vector.shape_cast %53 : vector<1x1x8x16xf32> to vector<8x16xf32>
    %cst_23 = arith.constant dense<0.000000e+00> : vector<8x896xf32>
    %55 = tpu.matmul %54, %7, %cst_23 {dimension_numbers = #tpu.dot_dimension_numbers<[1], [0], [0], [1], [0, 0, 1, 1], [], []>} : vector<8x16xf32>, vector<16x896xf32>, vector<8x896xf32> -> vector<8x896xf32>
    %56 = arith.mulf %55, %3 : vector<8x896xf32>
    %57 = arith.addf %52, %56 : vector<8x896xf32>
    %58 = vector.extract_strided_slice %6 {offsets = [1, 2, 0, 0], sizes = [1, 1, 8, 16], strides = [1, 1, 1, 1]} : vector<4x3x8x16xf32> to vector<1x1x8x16xf32>
    %59 = vector.shape_cast %58 : vector<1x1x8x16xf32> to vector<8x16xf32>
    %cst_24 = arith.constant dense<0.000000e+00> : vector<8x896xf32>
    %60 = tpu.matmul %59, %7, %cst_24 {dimension_numbers = #tpu.dot_dimension_numbers<[1], [0], [0], [1], [0, 0, 1, 1], [], []>} : vector<8x16xf32>, vector<16x896xf32>, vector<8x896xf32> -> vector<8x896xf32>
    %61 = arith.mulf %60, %4 : vector<8x896xf32>
    %62 = arith.addf %57, %61 : vector<8x896xf32>
    %63 = vector.extract_strided_slice %6 {offsets = [2, 2, 0, 0], sizes = [1, 1, 8, 16], strides = [1, 1, 1, 1]} : vector<4x3x8x16xf32> to vector<1x1x8x16xf32>
    %64 = vector.shape_cast %63 : vector<1x1x8x16xf32> to vector<8x16xf32>
    %cst_25 = arith.constant dense<0.000000e+00> : vector<8x896xf32>
    %65 = tpu.matmul %64, %7, %cst_25 {dimension_numbers = #tpu.dot_dimension_numbers<[1], [0], [0], [1], [0, 0, 1, 1], [], []>} : vector<8x16xf32>, vector<16x896xf32>, vector<8x896xf32> -> vector<8x896xf32>
    %66 = arith.mulf %65, %5 : vector<8x896xf32>
    %67 = arith.addf %62, %66 : vector<8x896xf32>
    %c2 = arith.constant 2 : index
    %c0_26 = arith.constant 0 : index
    %c0_27 = arith.constant 0 : index
    %68 = vector.load %arg5[%c2, %c0_26, %c0_27] : memref<3x8x896xf32, #tpu.memory_space<vmem>>, vector<1x8x896xf32>
    %69 = vector.shape_cast %68 : vector<1x8x896xf32> to vector<8x896xf32>
    %70 = vector.shape_cast %67 : vector<8x896xf32> to vector<1x8x896xf32>
    tpu.vector_store %arg5[%c2, %c0_26, %c0_27], %70 {strides = array<i32>} : memref<3x8x896xf32, #tpu.memory_space<vmem>>, vector<1x8x896xf32>,
    return
  }
  func.func @transform_0(%arg0: i32) -> (i32, i32) {
    %c0_i32 = arith.constant 0 : i32
    %c0_i32_0 = arith.constant 0 : i32
    return %arg0, %c0_i32 : i32, i32
  }
  func.func @transform_1(%arg0: i32) -> (i32, i32, i32, i32) {
    %c0_i32 = arith.constant 0 : i32
    %c0_i32_0 = arith.constant 0 : i32
    %c0_i32_1 = arith.constant 0 : i32
    %c0_i32_2 = arith.constant 0 : i32
    return %c0_i32, %c0_i32_0, %arg0, %c0_i32_1 : i32, i32, i32, i32
  }
  func.func @transform_2(%arg0: i32) -> (i32, i32) {
    %c0_i32 = arith.constant 0 : i32
    %c0_i32_0 = arith.constant 0 : i32
    %c0_i32_1 = arith.constant 0 : i32
    return %c0_i32, %c0_i32_0 : i32, i32
  }
  func.func @transform_3(%arg0: i32) -> (i32, i32) {
    %c0_i32 = arith.constant 0 : i32
    %c0_i32_0 = arith.constant 0 : i32
    %c0_i32_1 = arith.constant 0 : i32
    return %c0_i32, %c0_i32_0 : i32, i32
  }
  func.func @transform_4(%arg0: i32) -> (i32, i32, i32) {
    %c0_i32 = arith.constant 0 : i32
    %c0_i32_0 = arith.constant 0 : i32
    %c0_i32_1 = arith.constant 0 : i32
    return %c0_i32, %arg0, %c0_i32_0 : i32, i32, i32
  }
}

</mosaic_0001>

<bundles_post_ra>
// kernel: tpu_custom_call.1
= control target key start
LH: loop header
LB: loop body
LE: loop exit
PB: predicated region body
PF: predicated region fallthrough
CT: control target
= control target key end

     0   :  { %9 = vsyncpa [#allocation3], 0  ;;  %s6932_s0 = inlined_call_operand.hbm [shape: bf16[8,146], index: 0, kind: input, shape index: {}]   ;;  %s6933_s1 = inlined_call_operand.hbm [shape: f32[4,3,8,16], index: 1, kind: input, shape index: {}]   ;;  %s6934_s2 = inlined_call_operand.hbm [shape: bf16[146,2688], index: 2, kind: input, shape index: {}]   ;;  %s6935_s3 = inlined_call_operand.hbm [shape: f32[16,896], index: 3, kind: input, shape index: {}]   ;;  %s6936_s4 = inlined_call_operand.hbm [shape: f32[3,8,896], index: 4, kind: output, shape index: {}]  }
   0x1   :  { %10 = vsyncpa [#allocation6], 0 }
   0x2   :  { %11 = vsyncpa [#allocation9], 0 }
   0x3   :  { %12 = vsyncpa [#allocation4], 0  ;;  %s6435_s15 = smov [#allocation5]   ;;  %s6317_s19 = scalar_lea.hbm %s6933_s1, 1536 }
   0x4   :  { %s28_s16 = sshll.u32 %s6435_s15, 4  ;;  %p6318_p0 = scmp.ne.s32.totalorder %s6933_s1, %s6317_s19  ;;  %s29_s16 = int_to_ptr.vmem [resolvable:$true] %s28_s16 }
   0x5   :  { %p6321_p1 = scmp.lt.u32.totalorder %s6317_s19, %s6933_s1 }
   0x7   :  { %p6323_p2 = pnand %p6321_p1, %p6318_p0 }
   0x9   :  { %6326 = shalt.err (!%p6323_p2)
}
   0xa   :  { %s6327_s24 = scalar_lea.vmem %s29_s16, 1536  ;;  %p6332_p4 = scmp.lt.s32.totalorder %s29_s16, %s29_s16 }
   0xb   :  { %p6328_p3 = scmp.ne.s32.totalorder %s29_s16, %s6327_s24  ;;  %p6333_p5 = scmp.lt.s32.totalorder %s6327_s24, %s6327_s24 }
   0xd   :  { %p6334_p6 = por %p6333_p5, %p6332_p4 }
   0xf   :  { %p6335_p7 = pnand %p6334_p6, %p6328_p3 }
  0x11   :  { %6338 = shalt.err (!%p6335_p7)
}
  0x12   :  { %s6436_s25 = smov 128   ;;  %s6437_s26 = smov 8  }
  0x13   :  { %34 = dma.hbm_to_vmem [thread:$0]  %s6933_s1, 1536, %s29_s16, [#allocation6], %s6436_s25, %s6436_s25, %s6437_s26  }
  0x14   :  { %s6438_s29 = smov [#allocation2]   ;;  %s6439_s5 = smov [#allocation7]  }
  0x15   :  { %s19_s30 = sshll.u32 %s6438_s29, 4  ;;  %s40_s6 = sshll.u32 %s6439_s5, 4  ;;  %s20_s30 = int_to_ptr.vmem [resolvable:$true] %s19_s30  ;;  %s41_s6 = int_to_ptr.vmem [resolvable:$true] %s40_s6 }
  0x16   :  { %s6339_s9 = scalar_lea.hbm %s6932_s0, 128 }
  0x17   :  { %p6340_p8 = scmp.ne.s32.totalorder %s6932_s0, %s6339_s9  ;;  %p6343_p9 = scmp.lt.u32.totalorder %s6339_s9, %s6932_s0 }
  0x19   :  { %p6345_p10 = pnand %p6343_p9, %p6340_p8 }
  0x1b   :  { %6348 = shalt.err (!%p6345_p10)
}
  0x1c   :  { %s6349_s1 = scalar_lea.vmem %s20_s30, 128  ;;  %p6354_p12 = scmp.lt.s32.totalorder %s20_s30, %s20_s30 }
  0x1d   :  { %p6350_p11 = scmp.ne.s32.totalorder %s20_s30, %s6349_s1  ;;  %p6355_p13 = scmp.lt.s32.totalorder %s6349_s1, %s6349_s1 }
  0x1f   :  { %p6356_p0 = por %p6355_p13, %p6354_p12 }
  0x21   :  { %p6357_p1 = pnand %p6356_p0, %p6350_p11 }
  0x23   :  { %6360 = shalt.err (!%p6357_p1)
}
  0x24   :  { %22 = dma.hbm_to_vmem [thread:$0]  %s6932_s0, 128, %s20_s30, [#allocation3]  }
  0x25   :  { %s6361_s18 = scalar_lea.hbm %s6934_s2, 25536 }
  0x26   :  { %p6362_p2 = scmp.ne.s32.totalorder %s6934_s2, %s6361_s18  ;;  %p6365_p3 = scmp.lt.u32.totalorder %s6361_s18, %s6934_s2 }
  0x28   :  { %p6367_p4 = pnand %p6365_p3, %p6362_p2 }
  0x2a   :  { %6370 = shalt.err (!%p6367_p4)
}
  0x2b   :  { %s6371_s23 = scalar_lea.vmem %s41_s6, 25536  ;;  %p6376_p6 = scmp.lt.s32.totalorder %s41_s6, %s41_s6 }
  0x2c   :  { %p6372_p5 = scmp.ne.s32.totalorder %s41_s6, %s6371_s23  ;;  %p6377_p7 = scmp.lt.s32.totalorder %s6371_s23, %s6371_s23 }
  0x2e   :  { %p6378_p8 = por %p6377_p7, %p6376_p6 }
  0x30   :  { %p6379_p9 = pnand %p6378_p8, %p6372_p5 }
  0x32   :  { %6382 = shalt.err (!%p6379_p9)
}
  0x33   :  { %s6440_s0 = smov 1344   ;;  %s6441_s24 = smov 84  }
  0x34   :  { %46 = dma.hbm_to_vmem [thread:$0]  %s6934_s2, 25536, %s41_s6, [#allocation6], %s6440_s0, %s6440_s0, %s6441_s24  }
  0x35   :  { %s6442_s27 = smov [#allocation8]   ;;  %s6383_s5 = scalar_lea.hbm %s6935_s3, 1792 }
  0x36   :  { %s52_s28 = sshll.u32 %s6442_s27, 4  ;;  %p6384_p10 = scmp.ne.s32.totalorder %s6935_s3, %s6383_s5  ;;  %s53_s28 = int_to_ptr.vmem [resolvable:$true] %s52_s28 }
  0x37   :  { %p6387_p11 = scmp.lt.u32.totalorder %s6383_s5, %s6935_s3 }
  0x39   :  { %p6389_p12 = pnand %p6387_p11, %p6384_p10 }
  0x3b   :  { %6392 = shalt.err (!%p6389_p12)
}
  0x3c   :  { %s6393_s11 = scalar_lea.vmem %s53_s28, 1792  ;;  %p6398_p0 = scmp.lt.s32.totalorder %s53_s28, %s53_s28 }
  0x3d   :  { %p6394_p13 = scmp.ne.s32.totalorder %s53_s28, %s6393_s11  ;;  %p6399_p1 = scmp.lt.s32.totalorder %s6393_s11, %s6393_s11 }
  0x3f   :  { %p6400_p2 = por %p6399_p1, %p6398_p0 }
  0x41   :  { %p6401_p3 = pnand %p6400_p2, %p6394_p13 }
  0x43   :  { %6404 = shalt.err (!%p6401_p3)
}
  0x44   :  { %s6443_s2 = smov 896   ;;  %s6444_s6 = smov 56  }
  0x45   :  { %58 = dma.hbm_to_vmem [thread:$0]  %s6935_s3, 1792, %s53_s28, [#allocation9], %s6443_s2, %s6443_s2, %s6444_s6  }
  0x46   :  { %6427 = dma.done.wait [#allocation3], 128  }
  0x47   :  { %6428 = vsyncadd [#allocation3], 4294967168 }
  0x48   :  { %6429 = dma.done.wait [#allocation6], 27072  }
  0x49   :  { %6430 = vsyncadd [#allocation6], 4294940224 }
  0x4a   :  { %6431 = dma.done.wait [#allocation9], 1792  }
  0x4b   :  { %6432 = vsyncadd [#allocation9], 4294965504  ;;  %v6015_v0 = vld [vmem:[#allocation7 + $0x4] ss:$84 sps:$4 sm:$0xff]   ;;  %v6017_v1 = vld [vmem:[#allocation7 + $0xc] ss:$84 sps:$4 sm:$0xff]  }
  0x4c   :  { %1363 = vmatprep.subr.bf16.mxu0 %v6015_v0  ;;  %v6019_v2 = vld [vmem:[#allocation7] ss:$84 sps:$4 sm:$0xff]   ;;  %v6020_v3 = vld [vmem:[#allocation7 + $0x8] ss:$84 sps:$4 sm:$0xff]   ;;  %1404 = vmatprep.subr.bf16.mxu1 %v6017_v1  ;;  %v6026_v7 = vld [vmem:[#allocation7 + $0xb0] ss:$84 sps:$4 sm:$0xff]  }
  0x4d   :  { %v6021_v4 = vld [vmem:[#allocation7 + $0xac] ss:$84 sps:$4 sm:$0xff]   ;;  %1364 = vmatpush1.bf16.msra.mxu0 %v6019_v2  ;;  %1405 = vmatpush1.bf16.msra.mxu1 %v6020_v3  ;;  %v6023_v5 = vld [vmem:[#allocation7 + $0xb4] ss:$84 sps:$4 sm:$0xff]   ;;  %v6029_v9 = vld [vmem:[#allocation7 + $0x15c] ss:$84 sps:$4 sm:$0xff]  }
  0x4e   :  { %v6025_v6 = vld [vmem:[#allocation7 + $0xa8] ss:$84 sps:$4 sm:$0xff]   ;;  %1365 = vmatprep.subr.bf16.mxu0 %v6021_v4  ;;  %1406 = vmatprep.subr.bf16.mxu1 %v6023_v5  ;;  %v6031_v10 = vld [vmem:[#allocation7 + $0x150] ss:$84 sps:$4 sm:$0xff]   ;;  %v6032_v11 = vld [vmem:[#allocation7 + $0x158] ss:$84 sps:$4 sm:$0xff]  }
  0x4f   :  { %v6027_v8 = vld [vmem:[#allocation7 + $0x154] ss:$84 sps:$4 sm:$0xff]   ;;  %v6033_v12 = vld [vmem:[#allocation7 + $0x1fc] ss:$84 sps:$4 sm:$0xff]   ;;  %v6035_v13 = vld [vmem:[#allocation7 + $0x204] ss:$84 sps:$4 sm:$0xff]  }
  0x50   :  { %v6037_v14 = vld [vmem:[#allocation7 + $0x1f8] ss:$84 sps:$4 sm:$0xff]   ;;  %v6038_v15 = vld [vmem:[#allocation7 + $0x200] ss:$84 sps:$4 sm:$0xff]   ;;  %v6044_v19 = vld [vmem:[#allocation7 + $0x2a8] ss:$84 sps:$4 sm:$0xff]  }
  0x51   :  { %1366 = vmatpush1.bf16.msra.mxu0 %v6025_v6  ;;  %1407 = vmatpush1.bf16.msra.mxu1 %v6026_v7  ;;  %v6039_v16 = vld [vmem:[#allocation7 + $0x2a4] ss:$84 sps:$4 sm:$0xff]   ;;  %v6041_v17 = vld [vmem:[#allocation7 + $0x2ac] ss:$84 sps:$4 sm:$0xff]   ;;  %v6047_v21 = vld [vmem:[#allocation7 + $0x354] ss:$84 sps:$4 sm:$0xff]  }
  0x52   :  { %1367 = vmatprep.subr.bf16.mxu0 %v6027_v8  ;;  %1408 = vmatprep.subr.bf16.mxu1 %v6029_v9  ;;  %v6043_v18 = vld [vmem:[#allocation7 + $0x2a0] ss:$84 sps:$4 sm:$0xff]   ;;  %v6049_v22 = vld [vmem:[#allocation7 + $0x348] ss:$84 sps:$4 sm:$0xff]   ;;  %v6050_v23 = vld [vmem:[#allocation7 + $0x350] ss:$84 sps:$4 sm:$0xff]  }
  0x53   :  { %v6045_v20 = vld [vmem:[#allocation7 + $0x34c] ss:$84 sps:$4 sm:$0xff]   ;;  %v6051_v24 = vld [vmem:[#allocation7 + $0x3f4] ss:$84 sps:$4 sm:$0xff]   ;;  %v6053_v25 = vld [vmem:[#allocation7 + $0x3fc] ss:$84 sps:$4 sm:$0xff]  }
  0x54   :  { %v6055_v26 = vld [vmem:[#allocation7 + $0x3f0] ss:$84 sps:$4 sm:$0xff]   ;;  %v6056_v27 = vld [vmem:[#allocation7 + $0x3f8] ss:$84 sps:$4 sm:$0xff]   ;;  %v6062_v33 = vld [vmem:[#allocation7 + $0x4a0] ss:$84 sps:$4 sm:$0xff]  }
  0x55   :  { %1368 = vmatpush1.bf16.msra.mxu0 %v6031_v10  ;;  %1409 = vmatpush1.bf16.msra.mxu1 %v6032_v11  ;;  %v6057_v28 = vld [vmem:[#allocation7 + $0x49c] ss:$84 sps:$4 sm:$0xff]   ;;  %v6059_v30 = vld [vmem:[#allocation7 + $0x4a4] ss:$84 sps:$4 sm:$0xff]   ;;  %vm1295_vm0 = vcmask 146432   ;;  %vm1299_vm1 = vcmask 1040384  }
  0x56   :  { %1369 = vmatprep.subr.bf16.mxu0 %v6033_v12  ;;  %1410 = vmatprep.subr.bf16.mxu1 %v6035_v13  ;;  %v72_v29 = vld [vmem:[#allocation2] sm:$0xff]  ;;  %v6065_v35 = vld [vmem:[#allocation7 + $0x54c] ss:$84 sps:$4 sm:$0xff]   ;;  %v272_v37 = vld [vmem:[#allocation7 + $0x5f0] sm:$0x11]  ;;  %vm1839_vm2 = vcmask 130048  }
  0x57   :  { %v6526_v31 = vcombine.high %v72_v29, %v72_v29  ;;  %v6061_v32 = vld [vmem:[#allocation7 + $0x498] ss:$84 sps:$4 sm:$0xff]   ;;  %v6067_v38 = vld [vmem:[#allocation7 + $0x540] ss:$84 sps:$4 sm:$0xff]   ;;  %v6068_v39 = vld [vmem:[#allocation7 + $0x548] ss:$84 sps:$4 sm:$0xff]   ;;  %v5613_v41 = vcombine.high %v272_v37, %v272_v37  ;;  %v5612_v43 = vcombine.low %v272_v37, %v272_v37  ;;  %v6536_v48 = vcombine.low %v72_v29, %v72_v29 }
  0x58   :  { %v6063_v34 = vld [vmem:[#allocation7 + $0x544] ss:$84 sps:$4 sm:$0xff]   ;;  %v271_v36 = vld [vmem:[#allocation7 + $0x5e8] sm:$0x11]  ;;  %v6080_v47 = vld [vmem:[#allocation7 + $0x1c] ss:$84 sps:$4 sm:$0xff]  }
  0x59   :  { %1370 = vmatpush1.bf16.msra.mxu0 %v6037_v14  ;;  %1411 = vmatpush1.bf16.msra.mxu1 %v6038_v15  ;;  %v5611_v40 = vcombine.high %v271_v36, %v271_v36  ;;  %v5610_v42 = vcombine.low %v271_v36, %v271_v36  ;;  %v6077_v44 = vld [vmem:[#allocation7 + $0x14] ss:$84 sps:$4 sm:$0xff]   ;;  %v1307_v46 = vsel %vm1299_vm1, %v5612_v43, 0  ;;  %v6075_v49 = vld [vmem:[#allocation7 + $0x10] ss:$84 sps:$4 sm:$0xff]   ;;  %vm6448_vm3 = vmmov 0  }
  0x5a   :  { %1371 = vmatprep.subr.bf16.mxu0 %v6039_v16  ;;  %1412 = vmatprep.subr.bf16.mxu1 %v6041_v17  ;;  %v6078_v50 = vld [vmem:[#allocation7 + $0x18] ss:$84 sps:$4 sm:$0xff]   ;;  %v6083_v51 = vld [vmem:[#allocation7 + $0xbc] ss:$84 sps:$4 sm:$0xff]   ;;  %v6084_v54 = vld [vmem:[#allocation7 + $0xc0] ss:$84 sps:$4 sm:$0xff]  }
  0x5b   :  { %5632 = vmatprep.mubr.msk.bf16.mxu0 %vm1295_vm0, %v6526_v31  ;;  %5634 = vmatprep.mubr.msk.bf16.mxu1 %vm1295_vm0, %v6526_v31  ;;  %v1301_v45 = vsel %vm1299_vm1, %v5610_v42, 0  ;;  %v6086_v52 = vld [vmem:[#allocation7 + $0xc4] ss:$84 sps:$4 sm:$0xff]   ;;  %v6092_v56 = vld [vmem:[#allocation7 + $0x16c] ss:$84 sps:$4 sm:$0xff]   ;;  %s6449_s3 = smov [#allocation10]  }
  0x5c   :  { %v6081_v53 = vld [vmem:[#allocation7 + $0xb8] ss:$84 sps:$4 sm:$0xff]   ;;  %v6087_v57 = vld [vmem:[#allocation7 + $0x160] ss:$84 sps:$4 sm:$0xff]   ;;  %v6090_v58 = vld [vmem:[#allocation7 + $0x168] ss:$84 sps:$4 sm:$0xff]  }
  0x5d   :  { %1372 = vmatpush1.bf16.msra.mxu0 %v6043_v18  ;;  %1413 = vmatpush1.bf16.msra.mxu1 %v6044_v19  ;;  %v6089_v55 = vld [vmem:[#allocation7 + $0x164] ss:$84 sps:$4 sm:$0xff]   ;;  %v6095_v59 = vld [vmem:[#allocation7 + $0x20c] ss:$84 sps:$4 sm:$0xff]   ;;  %v6098_v60 = vld [vmem:[#allocation7 + $0x214] ss:$84 sps:$4 sm:$0xff]  }
  0x5e   :  { %1373 = vmatprep.subr.bf16.mxu0 %v6045_v20  ;;  %1414 = vmatprep.subr.bf16.mxu1 %v6047_v21  ;;  %v6093_v61 = vld [vmem:[#allocation7 + $0x208] ss:$84 sps:$4 sm:$0xff]   ;;  %v6096_v62 = vld [vmem:[#allocation7 + $0x210] ss:$84 sps:$4 sm:$0xff]   ;;  %v6102_v2 = vld [vmem:[#allocation7 + $0x2b8] ss:$84 sps:$4 sm:$0xff]  }
  0x5f   :  { %v6101_v63 = vld [vmem:[#allocation7 + $0x2b4] ss:$84 sps:$4 sm:$0xff]   ;;  %v6104_v0 = vld [vmem:[#allocation7 + $0x2bc] ss:$84 sps:$4 sm:$0xff]   ;;  %v6110_v4 = vld [vmem:[#allocation7 + $0x364] ss:$84 sps:$4 sm:$0xff]  }
  0x60   :  { %v6099_v1 = vld [vmem:[#allocation7 + $0x2b0] ss:$84 sps:$4 sm:$0xff]   ;;  %v6105_v5 = vld [vmem:[#allocation7 + $0x358] ss:$84 sps:$4 sm:$0xff]   ;;  %v6108_v6 = vld [vmem:[#allocation7 + $0x360] ss:$84 sps:$4 sm:$0xff]  }
  0x61   :  { %1374 = vmatpush1.bf16.msra.mxu0 %v6049_v22  ;;  %1415 = vmatpush1.bf16.msra.mxu1 %v6050_v23  ;;  %v6107_v3 = vld [vmem:[#allocation7 + $0x35c] ss:$84 sps:$4 sm:$0xff]   ;;  %v6113_v7 = vld [vmem:[#allocation7 + $0x404] ss:$84 sps:$4 sm:$0xff]   ;;  %v6116_v8 = vld [vmem:[#allocation7 + $0x40c] ss:$84 sps:$4 sm:$0xff]  }
  0x62   :  { %1375 = vmatprep.subr.bf16.mxu0 %v6051_v24  ;;  %1416 = vmatprep.subr.bf16.mxu1 %v6053_v25  ;;  %v6111_v9 = vld [vmem:[#allocation7 + $0x400] ss:$84 sps:$4 sm:$0xff]   ;;  %v6114_v10 = vld [vmem:[#allocation7 + $0x408] ss:$84 sps:$4 sm:$0xff]   ;;  %v6120_v14 = vld [vmem:[#allocation7 + $0x4b0] ss:$84 sps:$4 sm:$0xff]  }
  0x63   :  { %v6119_v11 = vld [vmem:[#allocation7 + $0x4ac] ss:$84 sps:$4 sm:$0xff]   ;;  %v6122_v12 = vld [vmem:[#allocation7 + $0x4b4] ss:$84 sps:$4 sm:$0xff]   ;;  %v6128_v16 = vld [vmem:[#allocation7 + $0x55c] ss:$84 sps:$4 sm:$0xff]  }
  0x64   :  { %v6117_v13 = vld [vmem:[#allocation7 + $0x4a8] ss:$84 sps:$4 sm:$0xff]   ;;  %v274_v18 = vld [vmem:[#allocation7 + $0x600] sm:$0x11]  ;;  %v6126_v20 = vld [vmem:[#allocation7 + $0x558] ss:$84 sps:$4 sm:$0xff]  }
  0x65   :  { %1376 = vmatpush1.bf16.msra.mxu0 %v6055_v26  ;;  %1417 = vmatpush1.bf16.msra.mxu1 %v6056_v27  ;;  %v6125_v15 = vld [vmem:[#allocation7 + $0x554] ss:$84 sps:$4 sm:$0xff]   ;;  %v273_v17 = vld [vmem:[#allocation7 + $0x5f8] sm:$0x11]  ;;  %v6123_v19 = vld [vmem:[#allocation7 + $0x550] ss:$84 sps:$4 sm:$0xff]   ;;  %v5617_v22 = vcombine.high %v274_v18, %v274_v18  ;;  %v5616_v24 = vcombine.low %v274_v18, %v274_v18 }
  0x66   :  { %1377 = vmatprep.subr.bf16.mxu0 %v6057_v28  ;;  %1418 = vmatprep.subr.bf16.mxu1 %v6059_v30  ;;  %v5615_v21 = vcombine.high %v273_v17, %v273_v17  ;;  %v5614_v23 = vcombine.low %v273_v17, %v273_v17  ;;  %v6135_v25 = vld [vmem:[#allocation7 + $0x24] ss:$84 sps:$4 sm:$0xff]   ;;  %v6138_v28 = vld [vmem:[#allocation7 + $0x2c] ss:$84 sps:$4 sm:$0xff]   ;;  %v6136_v30 = vld [vmem:[#allocation7 + $0x28] ss:$84 sps:$4 sm:$0xff]  }
  0x67   :  { %v1319_v27 = vsel %vm1299_vm1, %v5616_v24, 0  ;;  %v6133_v29 = vld [vmem:[#allocation7 + $0x20] ss:$84 sps:$4 sm:$0xff]   ;;  %v6150_v37 = vld [vmem:[#allocation7 + $0x17c] ss:$84 sps:$4 sm:$0xff]   ;;  %s5405_s1 = sshll.u32 %s6449_s3, 4  ;;  %s5406_s1 = int_to_ptr.vmem [resolvable:$true] %s5405_s1 }
  0x68   :  { %v1313_v26 = vsel %vm1299_vm1, %v5614_v23, 0  ;;  %v6147_v36 = vld [vmem:[#allocation7 + $0x174] ss:$84 sps:$4 sm:$0xff]   ;;  %v6151_v42 = vld [vmem:[#allocation7 + $0x218] ss:$84 sps:$4 sm:$0xff]   ;;  %s6405_s14 = scalar_lea.vmem %s5406_s1, 2688  ;;  %p6410_p5 = scmp.lt.s32.totalorder %s5406_s1, %s5406_s1 }
  0x69   :  { %1378 = vmatpush1.bf16.msra.mxu0 %v6061_v32  ;;  %1419 = vmatpush1.bf16.msra.mxu1 %v6062_v33  ;;  %v6141_v32 = vld [vmem:[#allocation7 + $0xcc] ss:$84 sps:$4 sm:$0xff]   ;;  %v6144_v33 = vld [vmem:[#allocation7 + $0xd4] ss:$84 sps:$4 sm:$0xff]   ;;  %v6205_v17 = vld [vmem:[#allocation7 + $0x184] ss:$84 sps:$4 sm:$0xff]   ;;  %p6406_p4 = scmp.ne.s32.totalorder %s5406_s1, %s6405_s14  ;;  %p6411_p6 = scmp.lt.s32.totalorder %s6405_s14, %s6405_s14 }
  0x6a   :  { %1379 = vmatprep.subr.bf16.mxu0 %v6063_v34  ;;  %1420 = vmatprep.subr.bf16.mxu1 %v6065_v35  ;;  %v6139_v34 = vld [vmem:[#allocation7 + $0xc8] ss:$84 sps:$4 sm:$0xff]   ;;  %v6142_v35 = vld [vmem:[#allocation7 + $0xd0] ss:$84 sps:$4 sm:$0xff]   ;;  %v6154_v43 = vld [vmem:[#allocation7 + $0x220] ss:$84 sps:$4 sm:$0xff]  }
  0x6b   :  { %v6208_v18 = vld [vmem:[#allocation7 + $0x18c] ss:$84 sps:$4 sm:$0xff]   ;;  %v6209_v23 = vld [vmem:[#allocation7 + $0x228] ss:$84 sps:$4 sm:$0xff]   ;;  %v6212_v24 = vld [vmem:[#allocation7 + $0x230] ss:$84 sps:$4 sm:$0xff]   ;;  %p6412_p7 = por %p6411_p6, %p6410_p5 }
  0x6d   :  { %1380 = vmatpush1.bf16.msra.mxu0 %v6067_v38  ;;  %1421 = vmatpush1.bf16.msra.mxu1 %v6068_v39  ;;  %v6145_v38 = vld [vmem:[#allocation7 + $0x170] ss:$84 sps:$4 sm:$0xff]   ;;  %v6148_v39 = vld [vmem:[#allocation7 + $0x178] ss:$84 sps:$4 sm:$0xff]   ;;  %p6413_p8 = pnand %p6412_p7, %p6406_p4 }
  0x6e   :  { %5631 = vmatprep.subr.msk.bf16.mxu0 %vm1299_vm1, %v5611_v40  ;;  %5633 = vmatprep.subr.msk.bf16.mxu1 %vm1299_vm1, %v5613_v41  ;;  %v6153_v40 = vld [vmem:[#allocation7 + $0x21c] ss:$84 sps:$4 sm:$0xff]   ;;  %v6156_v41 = vld [vmem:[#allocation7 + $0x224] ss:$84 sps:$4 sm:$0xff]  }
  0x71   :  { %1382 = vmatpush1.bf16.msra.mxu0 %v1301_v45  ;;  %1423 = vmatpush1.bf16.msra.mxu1 %v1307_v46  ;;  %v6162_v45 = vld [vmem:[#allocation7 + $0x2cc] ss:$84 sps:$4 sm:$0xff]  }
  0x72   :  { %1445 = vmatprep.subr.bf16.mxu0 %v6077_v44  ;;  %1486 = vmatprep.subr.bf16.mxu1 %v6080_v47  ;;  %v6159_v44 = vld [vmem:[#allocation7 + $0x2c4] ss:$84 sps:$4 sm:$0xff]   ;;  %v6157_v46 = vld [vmem:[#allocation7 + $0x2c0] ss:$84 sps:$4 sm:$0xff]   ;;  %v6160_v47 = vld [vmem:[#allocation7 + $0x2c8] ss:$84 sps:$4 sm:$0xff]  }
  0x74   :  { %1396 = vmatmul.mubr.bf16.vlgmr.msra.gmra.mrb[0].mxu0 %v6536_v48  ;;  %1437 = vmatmul.mubr.bf16.vlgmr.msra.gmra.mrb[0].mxu1 %v6536_v48 }
  0x75   :  { %1446 = vmatpush1.bf16.msra.mxu0 %v6075_v49  ;;  %1487 = vmatpush1.bf16.msra.mxu1 %v6078_v50  ;;  %v6165_v49 = vld [vmem:[#allocation7 + $0x36c] ss:$84 sps:$4 sm:$0xff]   ;;  %v6168_v50 = vld [vmem:[#allocation7 + $0x374] ss:$84 sps:$4 sm:$0xff]  }
  0x76   :  { %1447 = vmatprep.subr.bf16.mxu0 %v6083_v51  ;;  %1488 = vmatprep.subr.bf16.mxu1 %v6086_v52  ;;  %v6163_v51 = vld [vmem:[#allocation7 + $0x368] ss:$84 sps:$4 sm:$0xff]   ;;  %v6166_v52 = vld [vmem:[#allocation7 + $0x370] ss:$84 sps:$4 sm:$0xff]  }
  0x77   :  { %5636 = vmatprep.mubr.msk.bf16.mxu0 %vm1295_vm0, %v6526_v31  ;;  %5638 = vmatprep.mubr.msk.bf16.mxu1 %vm1295_vm0, %v6526_v31 }
  0x79   :  { %1448 = vmatpush1.bf16.msra.mxu0 %v6081_v53  ;;  %1489 = vmatpush1.bf16.msra.mxu1 %v6084_v54  ;;  %v6171_v53 = vld [vmem:[#allocation7 + $0x414] ss:$84 sps:$4 sm:$0xff]   ;;  %v6174_v54 = vld [vmem:[#allocation7 + $0x41c] ss:$84 sps:$4 sm:$0xff]  }
  0x7a   :  { %1449 = vmatprep.subr.bf16.mxu0 %v6089_v55  ;;  %1490 = vmatprep.subr.bf16.mxu1 %v6092_v56  ;;  %v6169_v55 = vld [vmem:[#allocation7 + $0x410] ss:$84 sps:$4 sm:$0xff]   ;;  %v6172_v56 = vld [vmem:[#allocation7 + $0x418] ss:$84 sps:$4 sm:$0xff]  }
  0x7d   :  { %1450 = vmatpush1.bf16.msra.mxu0 %v6087_v57  ;;  %1491 = vmatpush1.bf16.msra.mxu1 %v6090_v58  ;;  %v6177_v57 = vld [vmem:[#allocation7 + $0x4bc] ss:$84 sps:$4 sm:$0xff]   ;;  %v6180_v58 = vld [vmem:[#allocation7 + $0x4c4] ss:$84 sps:$4 sm:$0xff]  }
  0x7e   :  { %1451 = vmatprep.subr.bf16.mxu0 %v6095_v59  ;;  %1492 = vmatprep.subr.bf16.mxu1 %v6098_v60  ;;  %v6175_v59 = vld [vmem:[#allocation7 + $0x4b8] ss:$84 sps:$4 sm:$0xff]   ;;  %v6178_v60 = vld [vmem:[#allocation7 + $0x4c0] ss:$84 sps:$4 sm:$0xff]  }
  0x81   :  { %1452 = vmatpush1.bf16.msra.mxu0 %v6093_v61  ;;  %1493 = vmatpush1.bf16.msra.mxu1 %v6096_v62  ;;  %v6183_v61 = vld [vmem:[#allocation7 + $0x564] ss:$84 sps:$4 sm:$0xff]   ;;  %v6186_v62 = vld [vmem:[#allocation7 + $0x56c] ss:$84 sps:$4 sm:$0xff]  }
  0x82   :  { %1453 = vmatprep.subr.bf16.mxu0 %v6101_v63  ;;  %1494 = vmatprep.subr.bf16.mxu1 %v6104_v0  ;;  %v275_v63 = vld [vmem:[#allocation7 + $0x608] sm:$0x11]  ;;  %v276_v0 = vld [vmem:[#allocation7 + $0x610] sm:$0x11] }
  0x85   :  { %1454 = vmatpush1.bf16.msra.mxu0 %v6099_v1  ;;  %1495 = vmatpush1.bf16.msra.mxu1 %v6102_v2  ;;  %v6181_v1 = vld [vmem:[#allocation7 + $0x560] ss:$84 sps:$4 sm:$0xff]   ;;  %v6184_v2 = vld [vmem:[#allocation7 + $0x568] ss:$84 sps:$4 sm:$0xff]  }
  0x86   :  { %1455 = vmatprep.subr.bf16.mxu0 %v6107_v3  ;;  %1496 = vmatprep.subr.bf16.mxu1 %v6110_v4  ;;  %v5619_v3 = vcombine.high %v275_v63, %v275_v63  ;;  %v5621_v4 = vcombine.high %v276_v0, %v276_v0 }
  0x89   :  { %1456 = vmatpush1.bf16.msra.mxu0 %v6105_v5  ;;  %1497 = vmatpush1.bf16.msra.mxu1 %v6108_v6  ;;  %v5618_v5 = vcombine.low %v275_v63, %v275_v63  ;;  %v5620_v6 = vcombine.low %v276_v0, %v276_v0  ;;  %v6263_v63 = vld [vmem:[#allocation7 + $0x194] ss:$84 sps:$4 sm:$0xff]   ;;  %v6266_v0 = vld [vmem:[#allocation7 + $0x19c] ss:$84 sps:$4 sm:$0xff]  }
  0x8a   :  { %1457 = vmatprep.subr.bf16.mxu0 %v6113_v7  ;;  %1498 = vmatprep.subr.bf16.mxu1 %v6116_v8  ;;  %v6193_v7 = vld [vmem:[#allocation7 + $0x34] ss:$84 sps:$4 sm:$0xff]  }
  0x8b   :  { %v1325_v8 = vsel %vm1299_vm1, %v5618_v5, 0  ;;  %v6267_v5 = vld [vmem:[#allocation7 + $0x238] ss:$84 sps:$4 sm:$0xff]  }
  0x8d   :  { %1458 = vmatpush1.bf16.msra.mxu0 %v6111_v9  ;;  %1499 = vmatpush1.bf16.msra.mxu1 %v6114_v10  ;;  %v1331_v9 = vsel %vm1299_vm1, %v5620_v6, 0  ;;  %v6196_v10 = vld [vmem:[#allocation7 + $0x3c] ss:$84 sps:$4 sm:$0xff]   ;;  %v6270_v6 = vld [vmem:[#allocation7 + $0x240] ss:$84 sps:$4 sm:$0xff]  }
  0x8e   :  { %1459 = vmatprep.subr.bf16.mxu0 %v6119_v11  ;;  %1500 = vmatprep.subr.bf16.mxu1 %v6122_v12  ;;  %v6191_v11 = vld [vmem:[#allocation7 + $0x30] ss:$84 sps:$4 sm:$0xff]   ;;  %v6194_v12 = vld [vmem:[#allocation7 + $0x38] ss:$84 sps:$4 sm:$0xff]  }
  0x91   :  { %1460 = vmatpush1.bf16.msra.mxu0 %v6117_v13  ;;  %1501 = vmatpush1.bf16.msra.mxu1 %v6120_v14  ;;  %v6199_v13 = vld [vmem:[#allocation7 + $0xdc] ss:$84 sps:$4 sm:$0xff]   ;;  %v6202_v14 = vld [vmem:[#allocation7 + $0xe4] ss:$84 sps:$4 sm:$0xff]  }
  0x92   :  { %1461 = vmatprep.subr.bf16.mxu0 %v6125_v15  ;;  %1502 = vmatprep.subr.bf16.mxu1 %v6128_v16  ;;  %v6197_v15 = vld [vmem:[#allocation7 + $0xd8] ss:$84 sps:$4 sm:$0xff]   ;;  %v6200_v16 = vld [vmem:[#allocation7 + $0xe0] ss:$84 sps:$4 sm:$0xff]  }
  0x95   :  { %1462 = vmatpush1.bf16.msra.mxu0 %v6123_v19  ;;  %1503 = vmatpush1.bf16.msra.mxu1 %v6126_v20  ;;  %v6203_v19 = vld [vmem:[#allocation7 + $0x180] ss:$84 sps:$4 sm:$0xff]   ;;  %v6206_v20 = vld [vmem:[#allocation7 + $0x188] ss:$84 sps:$4 sm:$0xff]  }
  0x96   :  { %5635 = vmatprep.subr.msk.bf16.mxu0 %vm1299_vm1, %v5615_v21  ;;  %5637 = vmatprep.subr.msk.bf16.mxu1 %vm1299_vm1, %v5617_v22  ;;  %v6211_v21 = vld [vmem:[#allocation7 + $0x22c] ss:$84 sps:$4 sm:$0xff]   ;;  %v6214_v22 = vld [vmem:[#allocation7 + $0x234] ss:$84 sps:$4 sm:$0xff]  }
  0x99   :  { %1464 = vmatpush1.bf16.msra.mxu0 %v1313_v26  ;;  %1505 = vmatpush1.bf16.msra.mxu1 %v1319_v27  ;;  %v6220_v26 = vld [vmem:[#allocation7 + $0x2dc] ss:$84 sps:$4 sm:$0xff]  }
  0x9a   :  { %1527 = vmatprep.subr.bf16.mxu0 %v6135_v25  ;;  %1568 = vmatprep.subr.bf16.mxu1 %v6138_v28  ;;  %v6217_v25 = vld [vmem:[#allocation7 + $0x2d4] ss:$84 sps:$4 sm:$0xff]   ;;  %v6215_v27 = vld [vmem:[#allocation7 + $0x2d0] ss:$84 sps:$4 sm:$0xff]   ;;  %v6218_v28 = vld [vmem:[#allocation7 + $0x2d8] ss:$84 sps:$4 sm:$0xff]  }
  0x9c   :  { %1478 = vmatmul.mubr.bf16.vlgmr.msra.gmra.mrb[4].mxu0 %v6536_v48  ;;  %1519 = vmatmul.mubr.bf16.vlgmr.msra.gmra.mrb[4].mxu1 %v6536_v48 }
  0x9d   :  { %1528 = vmatpush1.bf16.msra.mxu0 %v6133_v29  ;;  %1569 = vmatpush1.bf16.msra.mxu1 %v6136_v30  ;;  %v6223_v29 = vld [vmem:[#allocation7 + $0x37c] ss:$84 sps:$4 sm:$0xff]   ;;  %v6226_v30 = vld [vmem:[#allocation7 + $0x384] ss:$84 sps:$4 sm:$0xff]  }
  0x9e   :  { %1529 = vmatprep.subr.bf16.mxu0 %v6141_v32  ;;  %1570 = vmatprep.subr.bf16.mxu1 %v6144_v33  ;;  %v6221_v32 = vld [vmem:[#allocation7 + $0x378] ss:$84 sps:$4 sm:$0xff]   ;;  %v6224_v33 = vld [vmem:[#allocation7 + $0x380] ss:$84 sps:$4 sm:$0xff]  }
  0x9f   :  { %5640 = vmatprep.mubr.msk.bf16.mxu0 %vm1295_vm0, %v6526_v31  ;;  %5642 = vmatprep.mubr.msk.bf16.mxu1 %vm1295_vm0, %v6526_v31 }
  0xa1   :  { %1530 = vmatpush1.bf16.msra.mxu0 %v6139_v34  ;;  %1571 = vmatpush1.bf16.msra.mxu1 %v6142_v35  ;;  %v6229_v34 = vld [vmem:[#allocation7 + $0x424] ss:$84 sps:$4 sm:$0xff]   ;;  %v6232_v35 = vld [vmem:[#allocation7 + $0x42c] ss:$84 sps:$4 sm:$0xff]  }
  0xa2   :  { %1531 = vmatprep.subr.bf16.mxu0 %v6147_v36  ;;  %1572 = vmatprep.subr.bf16.mxu1 %v6150_v37  ;;  %v6227_v36 = vld [vmem:[#allocation7 + $0x420] ss:$84 sps:$4 sm:$0xff]   ;;  %v6230_v37 = vld [vmem:[#allocation7 + $0x428] ss:$84 sps:$4 sm:$0xff]  }
  0xa5   :  { %1532 = vmatpush1.bf16.msra.mxu0 %v6145_v38  ;;  %1573 = vmatpush1.bf16.msra.mxu1 %v6148_v39  ;;  %v6235_v38 = vld [vmem:[#allocation7 + $0x4cc] ss:$84 sps:$4 sm:$0xff]   ;;  %v6238_v39 = vld [vmem:[#allocation7 + $0x4d4] ss:$84 sps:$4 sm:$0xff]  }
  0xa6   :  { %1533 = vmatprep.subr.bf16.mxu0 %v6153_v40  ;;  %1574 = vmatprep.subr.bf16.mxu1 %v6156_v41  ;;  %v6233_v40 = vld [vmem:[#allocation7 + $0x4c8] ss:$84 sps:$4 sm:$0xff]   ;;  %v6236_v41 = vld [vmem:[#allocation7 + $0x4d0] ss:$84 sps:$4 sm:$0xff]  }
  0xa9   :  { %1534 = vmatpush1.bf16.msra.mxu0 %v6151_v42  ;;  %1575 = vmatpush1.bf16.msra.mxu1 %v6154_v43  ;;  %v6241_v42 = vld [vmem:[#allocation7 + $0x574] ss:$84 sps:$4 sm:$0xff]   ;;  %v6244_v43 = vld [vmem:[#allocation7 + $0x57c] ss:$84 sps:$4 sm:$0xff]  }
  0xaa   :  { %1535 = vmatprep.subr.bf16.mxu0 %v6159_v44  ;;  %1576 = vmatprep.subr.bf16.mxu1 %v6162_v45  ;;  %v277_v44 = vld [vmem:[#allocation7 + $0x618] sm:$0x11]  ;;  %v278_v45 = vld [vmem:[#allocation7 + $0x620] sm:$0x11] }
  0xad   :  { %1536 = vmatpush1.bf16.msra.mxu0 %v6157_v46  ;;  %1577 = vmatpush1.bf16.msra.mxu1 %v6160_v47  ;;  %v6239_v46 = vld [vmem:[#allocation7 + $0x570] ss:$84 sps:$4 sm:$0xff]   ;;  %v6242_v47 = vld [vmem:[#allocation7 + $0x578] ss:$84 sps:$4 sm:$0xff]  }
  0xae   :  { %1537 = vmatprep.subr.bf16.mxu0 %v6165_v49  ;;  %1578 = vmatprep.subr.bf16.mxu1 %v6168_v50  ;;  %v5623_v49 = vcombine.high %v277_v44, %v277_v44  ;;  %v5625_v50 = vcombine.high %v278_v45, %v278_v45 }
  0xb1   :  { %1538 = vmatpush1.bf16.msra.mxu0 %v6163_v51  ;;  %1579 = vmatpush1.bf16.msra.mxu1 %v6166_v52  ;;  %v5622_v51 = vcombine.low %v277_v44, %v277_v44  ;;  %v5624_v52 = vcombine.low %v278_v45, %v278_v45  ;;  %v6445_v45 = vmov 0  }
  0xb2   :  { %1539 = vmatprep.subr.bf16.mxu0 %v6171_v53  ;;  %1580 = vmatprep.subr.bf16.mxu1 %v6174_v54 }
  0xb3   :  { %v1337_v53 = vsel %vm1299_vm1, %v5622_v51, 0  ;;  %v1343_v54 = vsel %vm1299_vm1, %v5624_v52, 0  ;;  %v1834_v51 = vld [vmem:[#allocation8 + $0x48] sm:$0xff] }
  0xb4   :  { %v1830_v52 = vld [vmem:[#allocation8 + $0x28] sm:$0xff] }
  0xb5   :  { %1540 = vmatpush1.bf16.msra.mxu0 %v6169_v55  ;;  %1581 = vmatpush1.bf16.msra.mxu1 %v6172_v56  ;;  %v6251_v55 = vld [vmem:[#allocation7 + $0x44] ss:$84 sps:$4 sm:$0xff]   ;;  %v6254_v56 = vld [vmem:[#allocation7 + $0x4c] ss:$84 sps:$4 sm:$0xff]  }
  0xb6   :  { %1541 = vmatprep.subr.bf16.mxu0 %v6177_v57  ;;  %1582 = vmatprep.subr.bf16.mxu1 %v6180_v58  ;;  %v6249_v57 = vld [vmem:[#allocation7 + $0x40] ss:$84 sps:$4 sm:$0xff]   ;;  %v6252_v58 = vld [vmem:[#allocation7 + $0x48] ss:$84 sps:$4 sm:$0xff]  }
  0xb9   :  { %1542 = vmatpush1.bf16.msra.mxu0 %v6175_v59  ;;  %1583 = vmatpush1.bf16.msra.mxu1 %v6178_v60  ;;  %v6257_v59 = vld [vmem:[#allocation7 + $0xec] ss:$84 sps:$4 sm:$0xff]   ;;  %v6260_v60 = vld [vmem:[#allocation7 + $0xf4] ss:$84 sps:$4 sm:$0xff]  }
  0xba   :  { %1543 = vmatprep.subr.bf16.mxu0 %v6183_v61  ;;  %1584 = vmatprep.subr.bf16.mxu1 %v6186_v62  ;;  %v6255_v61 = vld [vmem:[#allocation7 + $0xe8] ss:$84 sps:$4 sm:$0xff]   ;;  %v6258_v62 = vld [vmem:[#allocation7 + $0xf0] ss:$84 sps:$4 sm:$0xff]  }
  0xbd   :  { %1544 = vmatpush1.bf16.msra.mxu0 %v6181_v1  ;;  %1585 = vmatpush1.bf16.msra.mxu1 %v6184_v2  ;;  %v6261_v1 = vld [vmem:[#allocation7 + $0x190] ss:$84 sps:$4 sm:$0xff]   ;;  %v6264_v2 = vld [vmem:[#allocation7 + $0x198] ss:$84 sps:$4 sm:$0xff]  }
  0xbe   :  { %5639 = vmatprep.subr.msk.bf16.mxu0 %vm1299_vm1, %v5619_v3  ;;  %5641 = vmatprep.subr.msk.bf16.mxu1 %vm1299_vm1, %v5621_v4  ;;  %v6269_v3 = vld [vmem:[#allocation7 + $0x23c] ss:$84 sps:$4 sm:$0xff]   ;;  %v6272_v4 = vld [vmem:[#allocation7 + $0x244] ss:$84 sps:$4 sm:$0xff]  }
  0xc1   :  { %1546 = vmatpush1.bf16.msra.mxu0 %v1325_v8  ;;  %1587 = vmatpush1.bf16.msra.mxu1 %v1331_v9  ;;  %v6278_v8 = vld [vmem:[#allocation7 + $0x2ec] ss:$84 sps:$4 sm:$0xff]  }
  0xc2   :  { %1609 = vmatprep.subr.bf16.mxu0 %v6193_v7  ;;  %1650 = vmatprep.subr.bf16.mxu1 %v6196_v10  ;;  %v6275_v7 = vld [vmem:[#allocation7 + $0x2e4] ss:$84 sps:$4 sm:$0xff]   ;;  %v6273_v9 = vld [vmem:[#allocation7 + $0x2e0] ss:$84 sps:$4 sm:$0xff]   ;;  %v6276_v10 = vld [vmem:[#allocation7 + $0x2e8] ss:$84 sps:$4 sm:$0xff]  }
  0xc4   :  { %1560 = vmatmul.mubr.bf16.vlgmr.msra.gmra.mrb[8].mxu0 %v6536_v48  ;;  %1601 = vmatmul.mubr.bf16.vlgmr.msra.gmra.mrb[8].mxu1 %v6536_v48 }
  0xc5   :  { %1610 = vmatpush1.bf16.msra.mxu0 %v6191_v11  ;;  %1651 = vmatpush1.bf16.msra.mxu1 %v6194_v12  ;;  %v6281_v11 = vld [vmem:[#allocation7 + $0x38c] ss:$84 sps:$4 sm:$0xff]   ;;  %v6284_v12 = vld [vmem:[#allocation7 + $0x394] ss:$84 sps:$4 sm:$0xff]  }
  0xc6   :  { %1611 = vmatprep.subr.bf16.mxu0 %v6199_v13  ;;  %1652 = vmatprep.subr.bf16.mxu1 %v6202_v14  ;;  %v6279_v13 = vld [vmem:[#allocation7 + $0x388] ss:$84 sps:$4 sm:$0xff]   ;;  %v6282_v14 = vld [vmem:[#allocation7 + $0x390] ss:$84 sps:$4 sm:$0xff]  }
  0xc7   :  { %5644 = vmatprep.mubr.msk.bf16.mxu0 %vm1295_vm0, %v6526_v31  ;;  %5646 = vmatprep.mubr.msk.bf16.mxu1 %vm1295_vm0, %v6526_v31 }
  0xc9   :  { %1612 = vmatpush1.bf16.msra.mxu0 %v6197_v15  ;;  %1653 = vmatpush1.bf16.msra.mxu1 %v6200_v16  ;;  %v6287_v15 = vld [vmem:[#allocation7 + $0x434] ss:$84 sps:$4 sm:$0xff]   ;;  %v6290_v16 = vld [vmem:[#allocation7 + $0x43c] ss:$84 sps:$4 sm:$0xff]  }
  0xca   :  { %1613 = vmatprep.subr.bf16.mxu0 %v6205_v17  ;;  %1654 = vmatprep.subr.bf16.mxu1 %v6208_v18  ;;  %v6285_v17 = vld [vmem:[#allocation7 + $0x430] ss:$84 sps:$4 sm:$0xff]   ;;  %v6288_v18 = vld [vmem:[#allocation7 + $0x438] ss:$84 sps:$4 sm:$0xff]  }
  0xcd   :  { %1614 = vmatpush1.bf16.msra.mxu0 %v6203_v19  ;;  %1655 = vmatpush1.bf16.msra.mxu1 %v6206_v20  ;;  %v6293_v19 = vld [vmem:[#allocation7 + $0x4dc] ss:$84 sps:$4 sm:$0xff]   ;;  %v6296_v20 = vld [vmem:[#allocation7 + $0x4e4] ss:$84 sps:$4 sm:$0xff]  }
  0xce   :  { %1615 = vmatprep.subr.bf16.mxu0 %v6211_v21  ;;  %1656 = vmatprep.subr.bf16.mxu1 %v6214_v22  ;;  %v6291_v21 = vld [vmem:[#allocation7 + $0x4d8] ss:$84 sps:$4 sm:$0xff]   ;;  %v6294_v22 = vld [vmem:[#allocation7 + $0x4e0] ss:$84 sps:$4 sm:$0xff]  }
  0xd1   :  { %1616 = vmatpush1.bf16.msra.mxu0 %v6209_v23  ;;  %1657 = vmatpush1.bf16.msra.mxu1 %v6212_v24  ;;  %v6299_v23 = vld [vmem:[#allocation7 + $0x584] ss:$84 sps:$4 sm:$0xff]   ;;  %v6302_v24 = vld [vmem:[#allocation7 + $0x58c] ss:$84 sps:$4 sm:$0xff]  }
  0xd2   :  { %1617 = vmatprep.subr.bf16.mxu0 %v6217_v25  ;;  %1658 = vmatprep.subr.bf16.mxu1 %v6220_v26  ;;  %v279_v25 = vld [vmem:[#allocation7 + $0x628] sm:$0x11]  ;;  %v280_v26 = vld [vmem:[#allocation7 + $0x630] sm:$0x11] }
  0xd5   :  { %1618 = vmatpush1.bf16.msra.mxu0 %v6215_v27  ;;  %1659 = vmatpush1.bf16.msra.mxu1 %v6218_v28  ;;  %v6297_v27 = vld [vmem:[#allocation7 + $0x580] ss:$84 sps:$4 sm:$0xff]   ;;  %v6300_v28 = vld [vmem:[#allocation7 + $0x588] ss:$84 sps:$4 sm:$0xff]  }
  0xd6   :  { %1619 = vmatprep.subr.bf16.mxu0 %v6223_v29  ;;  %1660 = vmatprep.subr.bf16.mxu1 %v6226_v30  ;;  %v5627_v29 = vcombine.high %v279_v25, %v279_v25  ;;  %v5629_v30 = vcombine.high %v280_v26, %v280_v26 }
  0xd9   :  { %1620 = vmatpush1.bf16.msra.mxu0 %v6221_v32  ;;  %1661 = vmatpush1.bf16.msra.mxu1 %v6224_v33  ;;  %v5626_v32 = vcombine.low %v279_v25, %v279_v25  ;;  %v5628_v33 = vcombine.low %v280_v26, %v280_v26 }
  0xda   :  { %1621 = vmatprep.subr.bf16.mxu0 %v6229_v34  ;;  %1662 = vmatprep.subr.bf16.mxu1 %v6232_v35  ;;  %v1826_v34 = vld [vmem:[#allocation8 + $0x8] sm:$0xff]  ;;  %v1833_v35 = vld [vmem:[#allocation8 + $0x40] sm:$0xff] }
  0xdd   :  { %1622 = vmatpush1.bf16.msra.mxu0 %v6227_v36  ;;  %1663 = vmatpush1.bf16.msra.mxu1 %v6230_v37  ;;  %v1349_v36 = vsel %vm1299_vm1, %v5626_v32, 0  ;;  %v1355_v37 = vsel %vm1299_vm1, %v5628_v33, 0  ;;  %v1824_v32 = vld [vmem:[#allocation5 + $0x58] sm:$0xff]  ;;  %v1818_v33 = vld [vmem:[#allocation5 + $0x28] sm:$0xff] }
  0xde   :  { %1623 = vmatprep.subr.bf16.mxu0 %v6235_v38  ;;  %1664 = vmatprep.subr.bf16.mxu1 %v6238_v39  ;;  %v6578_v38 = vpack.c.bf16 %v1833_v35, %v1826_v34  ;;  %v1825_v39 = vld [vmem:[#allocation8] sm:$0xff] }
  0xdf   :  { %v1821_v34 = vld [vmem:[#allocation5 + $0x40] sm:$0xff] }
  0xe1   :  { %1624 = vmatpush1.bf16.msra.mxu0 %v6233_v40  ;;  %1665 = vmatpush1.bf16.msra.mxu1 %v6236_v41  ;;  %v1832_v40 = vld [vmem:[#allocation8 + $0x38] sm:$0xff] }
  0xe2   :  { %1625 = vmatprep.subr.bf16.mxu0 %v6241_v42  ;;  %1666 = vmatprep.subr.bf16.mxu1 %v6244_v43  ;;  %v1828_v41 = vld [vmem:[#allocation8 + $0x18] sm:$0xff]  ;;  %v1835_v42 = vld [vmem:[#allocation8 + $0x50] sm:$0xff]  ;;  %v6580_v44 = vpack.c.bf16 %v1832_v40, %v1825_v39 }
  0xe3   :  { %v6307_v43 = vld [vmem:[#allocation7 + $0x50] ss:$84 sps:$4 sm:$0xff]  }
  0xe5   :  { %1626 = vmatpush1.bf16.msra.mxu0 %v6239_v46  ;;  %1667 = vmatpush1.bf16.msra.mxu1 %v6242_v47  ;;  %v6584_v46 = vpack.c.bf16 %v1835_v42, %v1828_v41  ;;  %v6308_v47 = vld [vmem:[#allocation7 + $0xf8] ss:$84 sps:$4 sm:$0xff]  }
  0xe6   :  { %5643 = vmatprep.subr.msk.bf16.mxu0 %vm1299_vm1, %v5623_v49  ;;  %5645 = vmatprep.subr.msk.bf16.mxu1 %vm1299_vm1, %v5625_v50  ;;  %v6446_v49 = vmov 0.0   ;;  %v1827_v50 = vld [vmem:[#allocation8 + $0x10] sm:$0xff] }
  0xe9   :  { %1628 = vmatpush1.bf16.msra.mxu0 %v1337_v53  ;;  %1669 = vmatpush1.bf16.msra.mxu1 %v1343_v54  ;;  %v1837_v53 = vld [vmem:[#allocation8 + $0x60] sm:$0xff] }
  0xea   :  { %1691 = vmatprep.subr.bf16.mxu0 %v6251_v55  ;;  %1732 = vmatprep.subr.bf16.mxu1 %v6254_v56  ;;  %v1813_v54 = vld [vmem:[#allocation5] sm:$0xff]  ;;  %v6594_v56 = vpack.c.bf16 %v1834_v51, %v1827_v50 }
  0xeb   :  { %v6309_v55 = vld [vmem:[#allocation7 + $0x1a0] ss:$84 sps:$4 sm:$0xff]  }
  0xec   :  { %1642 = vmatmul.mubr.bf16.vlgmr.msra.gmra.mrb[12].mxu0 %v6536_v48  ;;  %1683 = vmatmul.mubr.bf16.vlgmr.msra.gmra.mrb[12].mxu1 %v6536_v48 }
  0xed   :  { %1692 = vmatpush1.bf16.msra.mxu0 %v6249_v57  ;;  %1733 = vmatpush1.bf16.msra.mxu1 %v6252_v58  ;;  %v1829_v57 = vld [vmem:[#allocation8 + $0x20] sm:$0xff]  ;;  %v1836_v58 = vld [vmem:[#allocation8 + $0x58] sm:$0xff] }
  0xee   :  { %1693 = vmatprep.subr.bf16.mxu0 %v6257_v59  ;;  %1734 = vmatprep.subr.bf16.mxu1 %v6260_v60  ;;  %v6597_v59 = vpack.c.bf16 %v1837_v53, %v1830_v52  ;;  %v6601_v60 = vpack.c.bf16 %v1836_v58, %v1829_v57 }
  0xef   :  { %5648 = vmatprep.mubr.msk.bf16.mxu0 %vm1295_vm0, %v6526_v31  ;;  %5650 = vmatprep.mubr.msk.bf16.mxu1 %vm1295_vm0, %v6526_v31 }
  0xf1   :  { %1694 = vmatpush1.bf16.msra.mxu0 %v6255_v61  ;;  %1735 = vmatpush1.bf16.msra.mxu1 %v6258_v62  ;;  %v1831_v61 = vld [vmem:[#allocation8 + $0x30] sm:$0xff]  ;;  %v1838_v62 = vld [vmem:[#allocation8 + $0x68] sm:$0xff] }
  0xf2   :  { %1695 = vmatprep.subr.bf16.mxu0 %v6263_v63  ;;  %1736 = vmatprep.subr.bf16.mxu1 %v6266_v0  ;;  %v6311_v63 = vld [vmem:[#allocation7 + $0x2f0] ss:$84 sps:$4 sm:$0xff]   ;;  %v6608_v0 = vpack.c.bf16 %v1838_v62, %v1831_v61 }
  0xf5   :  { %1696 = vmatpush1.bf16.msra.mxu0 %v6261_v1  ;;  %1737 = vmatpush1.bf16.msra.mxu1 %v6264_v2  ;;  %v6447_v1 = vmov 0.0|0.0   ;;  %v6312_v2 = vld [vmem:[#allocation7 + $0x398] ss:$84 sps:$4 sm:$0xff]  }
  0xf6   :  { %1697 = vmatprep.subr.bf16.mxu0 %v6269_v3  ;;  %1738 = vmatprep.subr.bf16.mxu1 %v6272_v4  ;;  %v1822_v3 = vld [vmem:[#allocation5 + $0x48] sm:$0xff]  ;;  %v6313_v4 = vld [vmem:[#allocation7 + $0x440] ss:$84 sps:$4 sm:$0xff]  }
  0xf9   :  { %1698 = vmatpush1.bf16.msra.mxu0 %v6267_v5  ;;  %1739 = vmatpush1.bf16.msra.mxu1 %v6270_v6  ;;  %v6314_v5 = vld [vmem:[#allocation7 + $0x4e8] ss:$84 sps:$4 sm:$0xff]   ;;  %v6315_v6 = vld [vmem:[#allocation7 + $0x590] ss:$84 sps:$4 sm:$0xff]  }
  0xfa   :  { %1699 = vmatprep.subr.bf16.mxu0 %v6275_v7  ;;  %1740 = vmatprep.subr.bf16.mxu1 %v6278_v8  ;;  %v6316_v7 = vld [vmem:[#allocation7 + $0x638] ss:$0 sps:$4 sm:$0x11]  }
  0xfb   :  { %v1361_v8 = vsel %vm1299_vm1, %v6316_v7, 0 }
  0xfd   :  { %1700 = vmatpush1.bf16.msra.mxu0 %v6273_v9  ;;  %1741 = vmatpush1.bf16.msra.mxu1 %v6276_v10  ;;  %v1816_v9 = vld [vmem:[#allocation5 + $0x18] sm:$0xff] }
  0xfe   :  { %1701 = vmatprep.subr.bf16.mxu0 %v6281_v11  ;;  %1742 = vmatprep.subr.bf16.mxu1 %v6284_v12 }
 0x101   :  { %1702 = vmatpush1.bf16.msra.mxu0 %v6279_v13  ;;  %1743 = vmatpush1.bf16.msra.mxu1 %v6282_v14 }
 0x102   :  { %1703 = vmatprep.subr.bf16.mxu0 %v6287_v15  ;;  %1744 = vmatprep.subr.bf16.mxu1 %v6290_v16 }
 0x105   :  { %1704 = vmatpush1.bf16.msra.mxu0 %v6285_v17  ;;  %1745 = vmatpush1.bf16.msra.mxu1 %v6288_v18  ;;  %v1814_v18 = vld [vmem:[#allocation5 + $0x8] sm:$0xff] }
 0x106   :  { %1705 = vmatprep.subr.bf16.mxu0 %v6293_v19  ;;  %1746 = vmatprep.subr.bf16.mxu1 %v6296_v20  ;;  %v1823_v19 = vld [vmem:[#allocation5 + $0x50] sm:$0xff]  ;;  %v1817_v20 = vld [vmem:[#allocation5 + $0x20] sm:$0xff] }
 0x109   :  { %1706 = vmatpush1.bf16.msra.mxu0 %v6291_v21  ;;  %1747 = vmatpush1.bf16.msra.mxu1 %v6294_v22  ;;  %v1820_v21 = vld [vmem:[#allocation5 + $0x38] sm:$0xff]  ;;  %v1815_v22 = vld [vmem:[#allocation5 + $0x10] sm:$0xff] }
 0x10a   :  { %1707 = vmatprep.subr.bf16.mxu0 %v6299_v23  ;;  %1748 = vmatprep.subr.bf16.mxu1 %v6302_v24 }
 0x10d   :  { %1708 = vmatpush1.bf16.msra.mxu0 %v6297_v27  ;;  %1749 = vmatpush1.bf16.msra.mxu1 %v6300_v28 }
 0x10e   :  { %5647 = vmatprep.subr.msk.bf16.mxu0 %vm1299_vm1, %v5627_v29  ;;  %5649 = vmatprep.subr.msk.bf16.mxu1 %vm1299_vm1, %v5629_v30 }
 0x111   :  { %1710 = vmatpush1.bf16.msra.mxu0 %v1349_v36  ;;  %1751 = vmatpush1.bf16.msra.mxu1 %v1355_v37 }
 0x112   :  { %1773 = vmatprep.subr.bf16.mxu0 %v6445_v45  ;;  %5821 = vmatprep.subr.bf16.mxu1 %v6578_v38 }
 0x114   :  { %1724 = vmatmul.mubr.bf16.vlgmr.msra.gmra.mrb[16].mxu0 %v6536_v48  ;;  %1765 = vmatmul.mubr.bf16.vlgmr.msra.gmra.mrb[16].mxu1 %v6536_v48 }
 0x115   :  { %1774 = vmatpush1.bf16.msra.mxu0 %v6307_v43  ;;  %5823 = vmatpush1.bf16.msra.mxu1 %v6580_v44 }
 0x116   :  { %1775 = vmatprep.subr.bf16.mxu0 %v6445_v45  ;;  %1907 = vmatprep.mubr.f32.mxu1 %v6446_v49 }
 0x117   :  { %5825 = vmatprep.subr.bf16.mxu1 %v6584_v46  ;;  %5651 = vmatprep.mubr.msk.bf16.mxu0 %vm1295_vm0, %v6526_v31  ;;  %v6310_v31 = vld [vmem:[#allocation7 + $0x248] ss:$84 sps:$4 sm:$0xff]  }
 0x119   :  { %1776 = vmatpush1.bf16.msra.mxu0 %v6308_v47 }
 0x11a   :  { %1777 = vmatprep.subr.bf16.mxu0 %v6445_v45 }
 0x11c   :  { %5652 = vmatmul.mubr.msk.f32.vlgmr.msra.gmra.mrb[20].mxu1 %vm1839_vm2, %v1813_v54 }
 0x11d   :  { %1778 = vmatpush1.bf16.msra.mxu0 %v6309_v55  ;;  %5827 = vmatpush1.bf16.msra.mxu1 %v6594_v56 }
 0x11e   :  { %1978 = vmatprep.mubr.f32.mxu1 %v6446_v49  ;;  %1779 = vmatprep.subr.bf16.mxu0 %v6445_v45 }
 0x11f   :  { %5829 = vmatprep.subr.bf16.mxu1 %v6597_v59 }
 0x120   :  { %5653 = vmatmul.mubr.msk.f32.vlgmr.msra.gmra.mrb[22].mxu1 %vm1839_vm2, %v1813_v54 }
 0x121   :  { %1780 = vmatpush1.bf16.msra.mxu0 %v6310_v31  ;;  %5831 = vmatpush1.bf16.msra.mxu1 %v6601_v60 }
 0x122   :  { %2049 = vmatprep.mubr.f32.mxu1 %v6446_v49  ;;  %1781 = vmatprep.subr.bf16.mxu0 %v6445_v45 }
 0x123   :  { %5832 = vmatprep.subr.bf16.mxu1 %v6447_v1 }
 0x124   :  { %5654 = vmatmul.mubr.msk.f32.vlgmr.msra.gmra.mrb[24].mxu1 %vm1839_vm2, %v1813_v54 }
 0x125   :  { %1782 = vmatpush1.bf16.msra.mxu0 %v6311_v63  ;;  %5834 = vmatpush3.bf16.msra.mxu1 %v6608_v0 }
 0x126   :  { %5740 = vmatprep.mubr.msk.f32.mxu1 %vm6448_vm3, %v6446_v49  ;;  %1783 = vmatprep.subr.bf16.mxu0 %v6445_v45 }
 0x127   :  { %5836 = vmatprep.subr.bf16.mxu1 %v6578_v38 }
 0x128   :  { %5741 = vmatmul.mubr.msk.f32.vlgmr.msra.gmra.mrb[26].mxu1 %vm1839_vm2, %v1813_v54 }
 0x129   :  { %1784 = vmatpush1.bf16.msra.mxu0 %v6312_v2  ;;  %5838 = vmatpush1.bf16.msra.mxu1 %v6580_v44 }
 0x12a   :  { %2200 = vmatprep.mubr.f32.mxu1 %v6446_v49  ;;  %1785 = vmatprep.subr.bf16.mxu0 %v6445_v45 }
 0x12b   :  { %5840 = vmatprep.subr.bf16.mxu1 %v6584_v46 }
 0x12c   :  { %5656 = vmatmul.mubr.msk.f32.vlgmr.msra.gmra.mrb[28].mxu1 %vm1839_vm2, %v1822_v3 }
 0x12d   :  { %1786 = vmatpush1.bf16.msra.mxu0 %v6313_v4  ;;  %5842 = vmatpush1.bf16.msra.mxu1 %v6594_v56 }
 0x12e   :  { %2271 = vmatprep.mubr.f32.mxu1 %v6446_v49  ;;  %1787 = vmatprep.subr.bf16.mxu0 %v6445_v45 }
 0x12f   :  { %5844 = vmatprep.subr.bf16.mxu1 %v6597_v59 }
 0x130   :  { %5657 = vmatmul.mubr.msk.f32.vlgmr.msra.gmra.mrb[30].mxu1 %vm1839_vm2, %v1822_v3 }
 0x131   :  { %1788 = vmatpush1.bf16.msra.mxu0 %v6314_v5  ;;  %5846 = vmatpush1.bf16.msra.mxu1 %v6601_v60 }
 0x132   :  { %2342 = vmatprep.mubr.f32.mxu1 %v6446_v49  ;;  %1789 = vmatprep.subr.bf16.mxu0 %v6445_v45 }
 0x133   :  { %5847 = vmatprep.subr.bf16.mxu1 %v6447_v1 }
 0x134   :  { %5658 = vmatmul.mubr.msk.f32.vlgmr.msra.gmra.mrb[32].mxu1 %vm1839_vm2, %v1822_v3 }
 0x135   :  { %1790 = vmatpush1.bf16.msra.mxu0 %v6315_v6  ;;  %5849 = vmatpush3.bf16.msra.mxu1 %v6608_v0 }
 0x136   :  { %5747 = vmatprep.mubr.msk.f32.mxu1 %vm6448_vm3, %v6446_v49  ;;  %1791 = vmatprep.subr.bf16.mxu0 %v6445_v45 }
 0x137   :  { %5851 = vmatprep.subr.bf16.mxu1 %v6578_v38 }
 0x138   :  { %5748 = vmatmul.mubr.msk.f32.vlgmr.msra.gmra.mrb[34].mxu1 %vm1839_vm2, %v1822_v3 }
 0x139   :  { %1792 = vmatpush1.bf16.msra.mxu0 %v1361_v8  ;;  %5853 = vmatpush1.bf16.msra.mxu1 %v6580_v44 }
 0x13a   :  { %2486 = vmatprep.mubr.f32.mxu1 %v6446_v49  ;;  %5855 = vmatprep.subr.bf16.mxu1 %v6584_v46 }
 0x13b   :  { %5859 = vmatprep.subr.bf16.mxu0 %v6597_v59 }
 0x13c   :  { %1806 = vmatmul.mubr.bf16.vlgmr.msra.gmra.mrb[20].mxu0 %v6536_v48  ;;  %5660 = vmatmul.mubr.msk.f32.vlgmr.msra.gmra.mrb[36].mxu1 %vm1839_vm2, %v1816_v9  ;;  %v1819_v48 = vld [vmem:[#allocation5 + $0x30] sm:$0xff] }
 0x13d   :  { %5857 = vmatpush1.bf16.msra.mxu1 %v6594_v56  ;;  %5861 = vmatpush1.bf16.msra.mxu0 %v6601_v60 }
 0x13e   :  { %2557 = vmatprep.mubr.f32.mxu1 %v6446_v49  ;;  %5862 = vmatprep.subr.bf16.mxu1 %v6447_v1 }
 0x13f   :  { %2628 = vmatprep.mubr.f32.mxu0 %v6446_v49  ;;  %5866 = vmatprep.subr.bf16.mxu0 %v6578_v38 }
 0x140   :  { %5661 = vmatmul.mubr.msk.f32.vlgmr.msra.gmra.mrb[38].mxu1 %vm1839_vm2, %v1816_v9 }
 0x141   :  { %5864 = vmatpush3.bf16.msra.mxu1 %v6608_v0  ;;  %5754 = vmatprep.mubr.msk.f32.mxu1 %vm6448_vm3, %v6446_v49 }
 0x142   :  { %5870 = vmatprep.subr.bf16.mxu1 %v6584_v46 }
 0x144   :  { %5662 = vmatmul.mubr.msk.f32.vlgmr.msra.gmra.mrb[24].mxu0 %vm1839_vm2, %v1816_v9  ;;  %5755 = vmatmul.mubr.msk.f32.vlgmr.msra.gmra.mrb[40].mxu1 %vm1839_vm2, %v1816_v9 }
 0x145   :  { %5868 = vmatpush1.bf16.msra.mxu0 %v6580_v44  ;;  %5872 = vmatpush1.bf16.msra.mxu1 %v6594_v56 }
 0x146   :  { %2786 = vmatprep.mubr.f32.mxu0 %v6446_v49  ;;  %2857 = vmatprep.mubr.f32.mxu1 %v6446_v49 }
 0x147   :  { %v6665_v10 = vpop.f32.mrb[0].mxu0  ;;  %v6667_v11 = vpop.f32.mrb[0].mxu1  ;;  %5874 = vmatprep.subr.bf16.mxu0 %v6597_v59  ;;  %5877 = vmatprep.subr.bf16.mxu1 %v6447_v1 }
 0x148   :  { %v6671_v12 = vpop.f32.mrb[1].mxu0  ;;  %v6673_v13 = vpop.f32.mrb[1].mxu1  ;;  %5664 = vmatmul.mubr.msk.f32.vlgmr.msra.gmra.mrb[26].mxu0 %vm1839_vm2, %v1819_v48  ;;  %5665 = vmatmul.mubr.msk.f32.vlgmr.msra.gmra.mrb[42].mxu1 %vm1839_vm2, %v1819_v48 }
 0x149   :  { %v1401_v14 = vpop.f32.mrb[2].mxu0  ;;  %v1442_v15 = vpop.f32.mrb[2].mxu1  ;;  %5876 = vmatpush1.bf16.msra.mxu0 %v6601_v60  ;;  %5879 = vmatpush3.bf16.msra.mxu1 %v6608_v0 }
 0x14a   :  { %v1402_v16 = vpop.f32.mrb[3].mxu0  ;;  %v1443_v17 = vpop.f32.mrb[3].mxu1  ;;  %2928 = vmatprep.mubr.f32.mxu0 %v6446_v49  ;;  %5761 = vmatprep.mubr.msk.f32.mxu1 %vm6448_vm3, %v6446_v49 }
 0x14b   :  { %5881 = vmatprep.subr.bf16.mxu0 %v6578_v38  ;;  %5885 = vmatprep.subr.bf16.mxu1 %v6584_v46 }
 0x14c   :  { %5666 = vmatmul.mubr.msk.f32.vlgmr.msra.gmra.mrb[28].mxu0 %vm1839_vm2, %v1819_v48  ;;  %5762 = vmatmul.mubr.msk.f32.vlgmr.msra.gmra.mrb[44].mxu1 %vm1839_vm2, %v1819_v48 }
 0x14d   :  { %5883 = vmatpush1.bf16.msra.mxu0 %v6580_v44  ;;  %5887 = vmatpush1.bf16.msra.mxu1 %v6594_v56 }
 0x14e   :  { %3093 = vmatprep.mubr.f32.mxu0 %v6446_v49  ;;  %3164 = vmatprep.mubr.f32.mxu1 %v6446_v49 }
 0x14f   :  { %5889 = vmatprep.subr.bf16.mxu0 %v6597_v59  ;;  %5892 = vmatprep.subr.bf16.mxu1 %v6447_v1 }
 0x150   :  { %5668 = vmatmul.mubr.msk.f32.vlgmr.msra.gmra.mrb[30].mxu0 %vm1839_vm2, %v1814_v18  ;;  %5669 = vmatmul.mubr.msk.f32.vlgmr.msra.gmra.mrb[46].mxu1 %vm1839_vm2, %v1814_v18 }
 0x151   :  { %5891 = vmatpush1.bf16.msra.mxu0 %v6601_v60  ;;  %5894 = vmatpush3.bf16.msra.mxu1 %v6608_v0 }
 0x152   :  { %3235 = vmatprep.mubr.f32.mxu0 %v6446_v49  ;;  %5768 = vmatprep.mubr.msk.f32.mxu1 %vm6448_vm3, %v6446_v49 }
 0x153   :  { %5896 = vmatprep.subr.bf16.mxu0 %v6578_v38  ;;  %5900 = vmatprep.subr.bf16.mxu1 %v6584_v46 }
 0x154   :  { %5670 = vmatmul.mubr.msk.f32.vlgmr.msra.gmra.mrb[32].mxu0 %vm1839_vm2, %v1814_v18  ;;  %5769 = vmatmul.mubr.msk.f32.vlgmr.msra.gmra.mrb[48].mxu1 %vm1839_vm2, %v1814_v18 }
 0x155   :  { %5898 = vmatpush1.bf16.msra.mxu0 %v6580_v44  ;;  %5902 = vmatpush1.bf16.msra.mxu1 %v6594_v56 }
 0x156   :  { %3386 = vmatprep.mubr.f32.mxu0 %v6446_v49  ;;  %3457 = vmatprep.mubr.f32.mxu1 %v6446_v49 }
 0x157   :  { %5904 = vmatprep.subr.bf16.mxu0 %v6597_v59  ;;  %5907 = vmatprep.subr.bf16.mxu1 %v6447_v1 }
 0x158   :  { %5672 = vmatmul.mubr.msk.f32.vlgmr.msra.gmra.mrb[34].mxu0 %vm1839_vm2, %v1823_v19  ;;  %5673 = vmatmul.mubr.msk.f32.vlgmr.msra.gmra.mrb[50].mxu1 %vm1839_vm2, %v1823_v19 }
 0x159   :  { %5906 = vmatpush1.bf16.msra.mxu0 %v6601_v60  ;;  %5909 = vmatpush3.bf16.msra.mxu1 %v6608_v0 }
 0x15a   :  { %3528 = vmatprep.mubr.f32.mxu0 %v6446_v49  ;;  %5775 = vmatprep.mubr.msk.f32.mxu1 %vm6448_vm3, %v6446_v49 }
 0x15b   :  { %5911 = vmatprep.subr.bf16.mxu0 %v6578_v38  ;;  %5915 = vmatprep.subr.bf16.mxu1 %v6584_v46 }
 0x15c   :  { %5674 = vmatmul.mubr.msk.f32.vlgmr.msra.gmra.mrb[36].mxu0 %vm1839_vm2, %v1823_v19  ;;  %5776 = vmatmul.mubr.msk.f32.vlgmr.msra.gmra.mrb[52].mxu1 %vm1839_vm2, %v1823_v19 }
 0x15d   :  { %5913 = vmatpush1.bf16.msra.mxu0 %v6580_v44  ;;  %5917 = vmatpush1.bf16.msra.mxu1 %v6594_v56 }
 0x15e   :  { %3672 = vmatprep.mubr.f32.mxu0 %v6446_v49  ;;  %3743 = vmatprep.mubr.f32.mxu1 %v6446_v49 }
 0x15f   :  { %5919 = vmatprep.subr.bf16.mxu0 %v6597_v59  ;;  %5922 = vmatprep.subr.bf16.mxu1 %v6447_v1 }
 0x160   :  { %5676 = vmatmul.mubr.msk.f32.vlgmr.msra.gmra.mrb[38].mxu0 %vm1839_vm2, %v1817_v20  ;;  %5677 = vmatmul.mubr.msk.f32.vlgmr.msra.gmra.mrb[54].mxu1 %vm1839_vm2, %v1817_v20 }
 0x161   :  { %5921 = vmatpush1.bf16.msra.mxu0 %v6601_v60  ;;  %5924 = vmatpush3.bf16.msra.mxu1 %v6608_v0 }
 0x162   :  { %3814 = vmatprep.mubr.f32.mxu0 %v6446_v49  ;;  %5782 = vmatprep.mubr.msk.f32.mxu1 %vm6448_vm3, %v6446_v49 }
 0x163   :  { %5926 = vmatprep.subr.bf16.mxu0 %v6578_v38  ;;  %5930 = vmatprep.subr.bf16.mxu1 %v6584_v46 }
 0x164   :  { %5678 = vmatmul.mubr.msk.f32.vlgmr.msra.gmra.mrb[40].mxu0 %vm1839_vm2, %v1817_v20  ;;  %5783 = vmatmul.mubr.msk.f32.vlgmr.msra.gmra.mrb[56].mxu1 %vm1839_vm2, %v1817_v20 }
 0x165   :  { %5928 = vmatpush1.bf16.msra.mxu0 %v6580_v44  ;;  %5932 = vmatpush1.bf16.msra.mxu1 %v6594_v56 }
 0x166   :  { %3972 = vmatprep.mubr.f32.mxu0 %v6446_v49  ;;  %4043 = vmatprep.mubr.f32.mxu1 %v6446_v49 }
 0x167   :  { %5934 = vmatprep.subr.bf16.mxu0 %v6597_v59  ;;  %5937 = vmatprep.subr.bf16.mxu1 %v6447_v1 }
 0x168   :  { %5680 = vmatmul.mubr.msk.f32.vlgmr.msra.gmra.mrb[42].mxu0 %vm1839_vm2, %v1820_v21  ;;  %5681 = vmatmul.mubr.msk.f32.vlgmr.msra.gmra.mrb[58].mxu1 %vm1839_vm2, %v1820_v21 }
 0x169   :  { %5936 = vmatpush1.bf16.msra.mxu0 %v6601_v60  ;;  %5939 = vmatpush3.bf16.msra.mxu1 %v6608_v0 }
 0x16a   :  { %4114 = vmatprep.mubr.f32.mxu0 %v6446_v49  ;;  %5789 = vmatprep.mubr.msk.f32.mxu1 %vm6448_vm3, %v6446_v49 }
 0x16b   :  { %5941 = vmatprep.subr.bf16.mxu0 %v6578_v38  ;;  %5945 = vmatprep.subr.bf16.mxu1 %v6584_v46 }
 0x16c   :  { %5682 = vmatmul.mubr.msk.f32.vlgmr.msra.gmra.mrb[44].mxu0 %vm1839_vm2, %v1820_v21  ;;  %5790 = vmatmul.mubr.msk.f32.vlgmr.msra.gmra.mrb[60].mxu1 %vm1839_vm2, %v1820_v21 }
 0x16d   :  { %5943 = vmatpush1.bf16.msra.mxu0 %v6580_v44  ;;  %5947 = vmatpush1.bf16.msra.mxu1 %v6594_v56 }
 0x16e   :  { %4280 = vmatprep.mubr.f32.mxu0 %v6446_v49  ;;  %4351 = vmatprep.mubr.f32.mxu1 %v6446_v49 }
 0x16f   :  { %v6758_v23 = vpop.f32.mrb[4].mxu0  ;;  %v6760_v24 = vpop.f32.mrb[4].mxu1  ;;  %5949 = vmatprep.subr.bf16.mxu0 %v6597_v59  ;;  %5952 = vmatprep.subr.bf16.mxu1 %v6447_v1 }
 0x170   :  { %v6764_v25 = vpop.f32.mrb[5].mxu0  ;;  %v6766_v26 = vpop.f32.mrb[5].mxu1  ;;  %5684 = vmatmul.mubr.msk.f32.vlgmr.msra.gmra.mrb[46].mxu0 %vm1839_vm2, %v1815_v22  ;;  %5685 = vmatmul.mubr.msk.f32.vlgmr.msra.gmra.mrb[62].mxu1 %vm1839_vm2, %v1815_v22 }
 0x171   :  { %v1483_v27 = vpop.f32.mrb[6].mxu0  ;;  %v1524_v28 = vpop.f32.mrb[6].mxu1  ;;  %5951 = vmatpush1.bf16.msra.mxu0 %v6601_v60  ;;  %5954 = vmatpush3.bf16.msra.mxu1 %v6608_v0 }
 0x172   :  { %v1484_v29 = vpop.f32.mrb[7].mxu0  ;;  %v1525_v30 = vpop.f32.mrb[7].mxu1  ;;  %4422 = vmatprep.mubr.f32.mxu0 %v6446_v49  ;;  %5796 = vmatprep.mubr.msk.f32.mxu1 %vm6448_vm3, %v6446_v49 }
 0x173   :  { %5956 = vmatprep.subr.bf16.mxu0 %v6578_v38  ;;  %5960 = vmatprep.subr.bf16.mxu1 %v6584_v46 }
 0x174   :  { %5686 = vmatmul.mubr.msk.f32.vlgmr.msra.gmra.mrb[48].mxu0 %vm1839_vm2, %v1815_v22  ;;  %5797 = vmatmul.mubr.msk.f32.vlgmr.msra.gmra.mrb[64].mxu1 %vm1839_vm2, %v1815_v22 }
 0x175   :  { %5958 = vmatpush1.bf16.msra.mxu0 %v6580_v44  ;;  %5962 = vmatpush1.bf16.msra.mxu1 %v6594_v56 }
 0x176   :  { %4573 = vmatprep.mubr.f32.mxu0 %v6446_v49  ;;  %4644 = vmatprep.mubr.f32.mxu1 %v6446_v49 }
 0x177   :  { %5964 = vmatprep.subr.bf16.mxu0 %v6597_v59  ;;  %5967 = vmatprep.subr.bf16.mxu1 %v6447_v1 }
 0x178   :  { %5688 = vmatmul.mubr.msk.f32.vlgmr.msra.gmra.mrb[50].mxu0 %vm1839_vm2, %v1824_v32  ;;  %5689 = vmatmul.mubr.msk.f32.vlgmr.msra.gmra.mrb[66].mxu1 %vm1839_vm2, %v1824_v32 }
 0x179   :  { %5966 = vmatpush1.bf16.msra.mxu0 %v6601_v60  ;;  %5969 = vmatpush3.bf16.msra.mxu1 %v6608_v0 }
 0x17a   :  { %4715 = vmatprep.mubr.f32.mxu0 %v6446_v49  ;;  %5803 = vmatprep.mubr.msk.f32.mxu1 %vm6448_vm3, %v6446_v49 }
 0x17b   :  { %5971 = vmatprep.subr.bf16.mxu0 %v6578_v38  ;;  %5975 = vmatprep.subr.bf16.mxu1 %v6584_v46 }
 0x17c   :  { %5690 = vmatmul.mubr.msk.f32.vlgmr.msra.gmra.mrb[52].mxu0 %vm1839_vm2, %v1824_v32  ;;  %5804 = vmatmul.mubr.msk.f32.vlgmr.msra.gmra.mrb[68].mxu1 %vm1839_vm2, %v1824_v32 }
 0x17d   :  { %5973 = vmatpush1.bf16.msra.mxu0 %v6580_v44  ;;  %5977 = vmatpush1.bf16.msra.mxu1 %v6594_v56 }
 0x17e   :  { %4859 = vmatprep.mubr.f32.mxu0 %v6446_v49  ;;  %4930 = vmatprep.mubr.f32.mxu1 %v6446_v49 }
 0x17f   :  { %5979 = vmatprep.subr.bf16.mxu0 %v6597_v59  ;;  %5982 = vmatprep.subr.bf16.mxu1 %v6447_v1 }
 0x180   :  { %5692 = vmatmul.mubr.msk.f32.vlgmr.msra.gmra.mrb[54].mxu0 %vm1839_vm2, %v1818_v33  ;;  %5693 = vmatmul.mubr.msk.f32.vlgmr.msra.gmra.mrb[70].mxu1 %vm1839_vm2, %v1818_v33 }
 0x181   :  { %5981 = vmatpush1.bf16.msra.mxu0 %v6601_v60  ;;  %5984 = vmatpush3.bf16.msra.mxu1 %v6608_v0 }
 0x182   :  { %5001 = vmatprep.mubr.f32.mxu0 %v6446_v49  ;;  %5810 = vmatprep.mubr.msk.f32.mxu1 %vm6448_vm3, %v6446_v49 }
 0x183   :  { %5986 = vmatprep.subr.bf16.mxu0 %v6578_v38  ;;  %5990 = vmatprep.subr.bf16.mxu1 %v6584_v46 }
 0x184   :  { %5694 = vmatmul.mubr.msk.f32.vlgmr.msra.gmra.mrb[56].mxu0 %vm1839_vm2, %v1818_v33  ;;  %5811 = vmatmul.mubr.msk.f32.vlgmr.msra.gmra.mrb[72].mxu1 %vm1839_vm2, %v1818_v33 }
 0x185   :  { %5988 = vmatpush1.bf16.msra.mxu0 %v6580_v44  ;;  %5992 = vmatpush1.bf16.msra.mxu1 %v6594_v56 }
 0x186   :  { %5159 = vmatprep.mubr.f32.mxu0 %v6446_v49  ;;  %5230 = vmatprep.mubr.f32.mxu1 %v6446_v49 }
 0x187   :  { %5994 = vmatprep.subr.bf16.mxu0 %v6597_v59  ;;  %5997 = vmatprep.subr.bf16.mxu1 %v6447_v1 }
 0x188   :  { %5696 = vmatmul.mubr.msk.f32.vlgmr.msra.gmra.mrb[58].mxu0 %vm1839_vm2, %v1821_v34  ;;  %5697 = vmatmul.mubr.msk.f32.vlgmr.msra.gmra.mrb[74].mxu1 %vm1839_vm2, %v1821_v34 }
 0x189   :  { %5996 = vmatpush1.bf16.msra.mxu0 %v6601_v60  ;;  %5999 = vmatpush3.bf16.msra.mxu1 %v6608_v0 }
 0x18a   :  { %5301 = vmatprep.mubr.f32.mxu0 %v6446_v49  ;;  %5817 = vmatprep.mubr.msk.f32.mxu1 %vm6448_vm3, %v6446_v49 }
 0x18c   :  { %5698 = vmatmul.mubr.msk.f32.vlgmr.msra.gmra.mrb[60].mxu0 %vm1839_vm2, %v1821_v34  ;;  %5818 = vmatmul.mubr.msk.f32.vlgmr.msra.gmra.mrb[76].mxu1 %vm1839_vm2, %v1821_v34 }
 0x197   :  { %v6828_v35 = vpop.f32.mrb[8].mxu0  ;;  %v6830_v36 = vpop.f32.mrb[8].mxu1 }
 0x198   :  { %v6832_v37 = vpop.f32.mrb[9].mxu0  ;;  %v6834_v38 = vpop.f32.mrb[9].mxu1 }
 0x199   :  { %v1565_v39 = vpop.f32.mrb[10].mxu0  ;;  %v1606_v40 = vpop.f32.mrb[10].mxu1 }
 0x19a   :  { %v1566_v41 = vpop.f32.mrb[11].mxu0  ;;  %v1607_v42 = vpop.f32.mrb[11].mxu1 }
 0x1bf   :  { %v6836_v43 = vpop.f32.mrb[12].mxu0  ;;  %v6838_v44 = vpop.f32.mrb[12].mxu1 }
 0x1c0   :  { %v6840_v45 = vpop.f32.mrb[13].mxu0  ;;  %v6842_v46 = vpop.f32.mrb[13].mxu1 }
 0x1c1   :  { %v1647_v47 = vpop.f32.mrb[14].mxu0  ;;  %v1688_v49 = vpop.f32.mrb[14].mxu1 }
 0x1c2   :  { %v1648_v50 = vpop.f32.mrb[15].mxu0  ;;  %v1689_v51 = vpop.f32.mrb[15].mxu1 }
 0x1e7   :  { %v6844_v52 = vpop.f32.mrb[16].mxu0  ;;  %v6846_v53 = vpop.f32.mrb[16].mxu1 }
 0x1e8   :  { %v6848_v54 = vpop.f32.mrb[17].mxu0  ;;  %v6850_v55 = vpop.f32.mrb[17].mxu1 }
 0x1e9   :  { %v1729_v56 = vpop.f32.mrb[18].mxu0  ;;  %v1770_v57 = vpop.f32.mrb[18].mxu1 }
 0x1ea   :  { %v1730_v58 = vpop.f32.mrb[19].mxu0  ;;  %v1771_v59 = vpop.f32.mrb[19].mxu1 }
 0x1ef   :  { %v1909_v31 = vpop.f32.mrb[20].mxu1 }
 0x1f0   :  { %v2126_v60 = vmul.f32 %v1909_v31, %v6665_v10  ;;  %v1911_v61 = vpop.f32.mrb[21].mxu1 }
 0x1f1   :  { %v2127_v62 = vmul.f32 %v1911_v61, %v6671_v12 }
 0x1f3   :  { %v1980_v63 = vpop.f32.mrb[22].mxu1 }
 0x1f4   :  { %v2128_v0 = vmul.f32 %v1980_v63, %v6667_v11  ;;  %v1982_v1 = vpop.f32.mrb[23].mxu1 }
 0x1f5   :  { %v2129_v2 = vmul.f32 %v1982_v1, %v6673_v13 }
 0x1f7   :  { %v2051_v3 = vpop.f32.mrb[24].mxu1 }
 0x1f8   :  { %v2130_v4 = vmul.f32 %v2051_v3, %v6758_v23  ;;  %v2053_v5 = vpop.f32.mrb[25].mxu1 }
 0x1f9   :  { %v2131_v6 = vmul.f32 %v2053_v5, %v6764_v25 }
 0x1fb   :  { %v2122_v7 = vpop.f32.mrb[26].mxu1 }
 0x1fc   :  { %v2132_v8 = vmul.f32 %v2122_v7, %v6760_v24  ;;  %v5742_v9 = vpop.f32.mrb[27].mxu1 }
 0x1ff   :  { %v2202_v48 = vpop.f32.mrb[28].mxu1 }
 0x200   :  { %v2203_v14 = vadd.f32 %v2202_v48, %v2126_v60  ;;  %v2204_v15 = vpop.f32.mrb[29].mxu1 }
 0x201   :  { %v2205_v16 = vadd.f32 %v2204_v15, %v2127_v62 }
 0x203   :  { %v2273_v17 = vpop.f32.mrb[30].mxu1 }
 0x204   :  { %v2274_v18 = vadd.f32 %v2273_v17, %v2128_v0  ;;  %v2275_v19 = vpop.f32.mrb[31].mxu1 }
 0x205   :  { %v2276_v20 = vadd.f32 %v2275_v19, %v2129_v2 }
 0x207   :  { %v2344_v21 = vpop.f32.mrb[32].mxu1 }
 0x208   :  { %v2345_v22 = vadd.f32 %v2344_v21, %v2130_v4  ;;  %v2346_v27 = vpop.f32.mrb[33].mxu1 }
 0x209   :  { %v2347_v28 = vadd.f32 %v2346_v27, %v2131_v6 }
 0x20b   :  { %v2415_v29 = vpop.f32.mrb[34].mxu1 }
 0x20c   :  { %v2416_v30 = vadd.f32 %v2415_v29, %v2132_v8  ;;  %v5749_v32 = vpop.f32.mrb[35].mxu1 }
 0x20f   :  { %v6859_v33 = vpop.f32.mrb[20].mxu0  ;;  %v2488_v34 = vpop.f32.mrb[36].mxu1 }
 0x210   :  { %v2705_v39 = vmul.f32 %v2488_v34, %v6766_v26  ;;  %v1809_v40 = vpop.f32.mrb[21].mxu0  ;;  %v2490_v41 = vpop.f32.mrb[37].mxu1 }
 0x211   :  { %v2706_v42 = vmul.f32 %v2490_v41, %v6828_v35  ;;  %v1810_v47 = vpop.f32.mrb[22].mxu0 }
 0x212   :  { %v2712_v49 = vadd.f32 %v2705_v39, %v2203_v14  ;;  %v1811_v50 = vpop.f32.mrb[23].mxu0 }
 0x213   :  { %v2713_v51 = vadd.f32 %v2706_v42, %v2205_v16  ;;  %v2559_v56 = vpop.f32.mrb[38].mxu1 }
 0x214   :  { %v2707_v57 = vmul.f32 %v2559_v56, %v6832_v37  ;;  %v2561_v58 = vpop.f32.mrb[39].mxu1 }
 0x215   :  { %v2708_v59 = vmul.f32 %v2561_v58, %v6830_v36 }
 0x216   :  { %v2714_v31 = vadd.f32 %v2707_v57, %v2274_v18 }
 0x217   :  { %v2715_v60 = vadd.f32 %v2708_v59, %v2276_v20  ;;  %v2630_v61 = vpop.f32.mrb[24].mxu0  ;;  %v2701_v62 = vpop.f32.mrb[40].mxu1 }
 0x218   :  { %v2709_v63 = vmul.f32 %v2630_v61, %v6834_v38  ;;  %v2711_v0 = vmul.f32 %v2701_v62, %v6840_v45  ;;  %v2632_v1 = vpop.f32.mrb[25].mxu0  ;;  %v5756_v2 = vpop.f32.mrb[41].mxu1 }
 0x219   :  { %v2710_v3 = vmul.f32 %v2632_v1, %v6836_v43 }
 0x21a   :  { %v2716_v4 = vadd.f32 %v2709_v63, %v2345_v22  ;;  %v2718_v5 = vadd.f32 %v2711_v0, %v2416_v30 }
 0x21b   :  { %v2717_v6 = vadd.f32 %v2710_v3, %v2347_v28  ;;  %v2788_v7 = vpop.f32.mrb[26].mxu0  ;;  %v2859_v8 = vpop.f32.mrb[42].mxu1 }
 0x21c   :  { %v3005_v9 = vmul.f32 %v2788_v7, %v6838_v44  ;;  %v3007_v48 = vmul.f32 %v2859_v8, %v6844_v52  ;;  %v2790_v14 = vpop.f32.mrb[27].mxu0  ;;  %v2861_v15 = vpop.f32.mrb[43].mxu1 }
 0x21d   :  { %v3006_v16 = vmul.f32 %v2790_v14, %v6842_v46  ;;  %v3008_v17 = vmul.f32 %v2861_v15, %v6848_v54 }
 0x21e   :  { %v3012_v18 = vadd.f32 %v3005_v9, %v2712_v49  ;;  %v3014_v19 = vadd.f32 %v3007_v48, %v2714_v31 }
 0x21f   :  { %v3013_v20 = vadd.f32 %v3006_v16, %v2713_v51  ;;  %v3015_v21 = vadd.f32 %v3008_v17, %v2715_v60  ;;  %v2930_v27 = vpop.f32.mrb[28].mxu0  ;;  %v3001_v22 = vpop.f32.mrb[44].mxu1 }
 0x220   :  { %3019 = vst [vmem:[#allocation10] sm:$0xff] %v3012_v18  ;;  %3021 = vst [vmem:[#allocation10 + $0x10] sm:$0xff] %v3014_v19  ;;  %v3009_v28 = vmul.f32 %v2930_v27, %v6846_v53  ;;  %v3011_v29 = vmul.f32 %v3001_v22, %v6859_v33  ;;  %v2932_v30 = vpop.f32.mrb[29].mxu0  ;;  %v5763_v32 = vpop.f32.mrb[45].mxu1 }
 0x221   :  { %3020 = vst [vmem:[#allocation10 + $0x8] sm:$0xff] %v3013_v20  ;;  %3022 = vst [vmem:[#allocation10 + $0x18] sm:$0xff] %v3015_v21  ;;  %v3010_v34 = vmul.f32 %v2932_v30, %v6850_v55 }
 0x222   :  { %v3016_v39 = vadd.f32 %v3009_v28, %v2716_v4  ;;  %v3018_v40 = vadd.f32 %v3011_v29, %v2718_v5 }
 0x223   :  { %v3017_v41 = vadd.f32 %v3010_v34, %v2717_v6  ;;  %v3095_v42 = vpop.f32.mrb[30].mxu0  ;;  %v3166_v47 = vpop.f32.mrb[46].mxu1 }
 0x224   :  { %3023 = vst [vmem:[#allocation10 + $0x20] sm:$0xff] %v3016_v39  ;;  %3025 = vst [vmem:[#allocation10 + $0x30] sm:$0xff] %v3018_v40  ;;  %v3312_v49 = vmul.f32 %v3095_v42, %v6665_v10  ;;  %v3314_v50 = vmul.f32 %v3166_v47, %v6667_v11  ;;  %v3097_v51 = vpop.f32.mrb[31].mxu0  ;;  %v3168_v56 = vpop.f32.mrb[47].mxu1 }
 0x225   :  { %3024 = vst [vmem:[#allocation10 + $0x28] sm:$0xff] %v3017_v41  ;;  %v3313_v57 = vmul.f32 %v3097_v51, %v6671_v12  ;;  %v3315_v58 = vmul.f32 %v3168_v56, %v6673_v13 }
 0x227   :  { %v3237_v59 = vpop.f32.mrb[32].mxu0  ;;  %v3308_v31 = vpop.f32.mrb[48].mxu1 }
 0x228   :  { %v3316_v60 = vmul.f32 %v3237_v59, %v6758_v23  ;;  %v3318_v61 = vmul.f32 %v3308_v31, %v6760_v24  ;;  %v3239_v62 = vpop.f32.mrb[33].mxu0  ;;  %v5770_v63 = vpop.f32.mrb[49].mxu1 }
 0x229   :  { %v3317_v0 = vmul.f32 %v3239_v62, %v6764_v25 }
 0x22b   :  { %v3388_v1 = vpop.f32.mrb[34].mxu0  ;;  %v3459_v2 = vpop.f32.mrb[50].mxu1 }
 0x22c   :  { %v3389_v3 = vadd.f32 %v3388_v1, %v3312_v49  ;;  %v3460_v4 = vadd.f32 %v3459_v2, %v3314_v50  ;;  %v3390_v5 = vpop.f32.mrb[35].mxu0  ;;  %v3461_v6 = vpop.f32.mrb[51].mxu1 }
 0x22d   :  { %v3391_v7 = vadd.f32 %v3390_v5, %v3313_v57  ;;  %v3462_v8 = vadd.f32 %v3461_v6, %v3315_v58 }
 0x22f   :  { %v3530_v9 = vpop.f32.mrb[36].mxu0  ;;  %v3601_v48 = vpop.f32.mrb[52].mxu1 }
 0x230   :  { %v3531_v14 = vadd.f32 %v3530_v9, %v3316_v60  ;;  %v3602_v15 = vadd.f32 %v3601_v48, %v3318_v61  ;;  %v3532_v16 = vpop.f32.mrb[37].mxu0  ;;  %v5777_v17 = vpop.f32.mrb[53].mxu1 }
 0x231   :  { %v3533_v18 = vadd.f32 %v3532_v16, %v3317_v0 }
 0x233   :  { %v3674_v19 = vpop.f32.mrb[38].mxu0  ;;  %v3745_v20 = vpop.f32.mrb[54].mxu1 }
 0x234   :  { %v3891_v21 = vmul.f32 %v3674_v19, %v6766_v26  ;;  %v3893_v27 = vmul.f32 %v3745_v20, %v6832_v37  ;;  %v3676_v22 = vpop.f32.mrb[39].mxu0  ;;  %v3747_v28 = vpop.f32.mrb[55].mxu1 }
 0x235   :  { %v3892_v29 = vmul.f32 %v3676_v22, %v6828_v35  ;;  %v3894_v30 = vmul.f32 %v3747_v28, %v6830_v36 }
 0x236   :  { %v3898_v32 = vadd.f32 %v3891_v21, %v3389_v3  ;;  %v3900_v34 = vadd.f32 %v3893_v27, %v3460_v4 }
 0x237   :  { %v3899_v39 = vadd.f32 %v3892_v29, %v3391_v7  ;;  %v3901_v40 = vadd.f32 %v3894_v30, %v3462_v8  ;;  %v3816_v41 = vpop.f32.mrb[40].mxu0  ;;  %v3887_v42 = vpop.f32.mrb[56].mxu1 }
 0x238   :  { %v3895_v47 = vmul.f32 %v3816_v41, %v6834_v38  ;;  %v3897_v49 = vmul.f32 %v3887_v42, %v6840_v45  ;;  %v3818_v50 = vpop.f32.mrb[41].mxu0  ;;  %v5784_v51 = vpop.f32.mrb[57].mxu1 }
 0x239   :  { %v3896_v56 = vmul.f32 %v3818_v50, %v6836_v43 }
 0x23a   :  { %v3902_v57 = vadd.f32 %v3895_v47, %v3531_v14  ;;  %v3904_v58 = vadd.f32 %v3897_v49, %v3602_v15 }
 0x23b   :  { %v3903_v59 = vadd.f32 %v3896_v56, %v3533_v18  ;;  %v3974_v31 = vpop.f32.mrb[42].mxu0  ;;  %v4045_v60 = vpop.f32.mrb[58].mxu1 }
 0x23c   :  { %v4191_v61 = vmul.f32 %v3974_v31, %v6838_v44  ;;  %v4193_v62 = vmul.f32 %v4045_v60, %v6844_v52  ;;  %v3976_v63 = vpop.f32.mrb[43].mxu0  ;;  %v4047_v0 = vpop.f32.mrb[59].mxu1 }
 0x23d   :  { %v4192_v1 = vmul.f32 %v3976_v63, %v6842_v46  ;;  %v4194_v2 = vmul.f32 %v4047_v0, %v6848_v54 }
 0x23e   :  { %v4198_v3 = vadd.f32 %v4191_v61, %v3898_v32  ;;  %v4200_v4 = vadd.f32 %v4193_v62, %v3900_v34 }
 0x23f   :  { %v4199_v5 = vadd.f32 %v4192_v1, %v3899_v39  ;;  %v4201_v6 = vadd.f32 %v4194_v2, %v3901_v40  ;;  %v4116_v7 = vpop.f32.mrb[44].mxu0  ;;  %v4187_v8 = vpop.f32.mrb[60].mxu1 }
 0x240   :  { %4206 = vst [vmem:[#allocation10 + $0x38] sm:$0xff] %v4198_v3  ;;  %4208 = vst [vmem:[#allocation10 + $0x48] sm:$0xff] %v4200_v4  ;;  %v4195_v9 = vmul.f32 %v4116_v7, %v6846_v53  ;;  %v4197_v48 = vmul.f32 %v4187_v8, %v6859_v33  ;;  %v4118_v14 = vpop.f32.mrb[45].mxu0  ;;  %v5791_v15 = vpop.f32.mrb[61].mxu1 }
 0x241   :  { %4207 = vst [vmem:[#allocation10 + $0x40] sm:$0xff] %v4199_v5  ;;  %4209 = vst [vmem:[#allocation10 + $0x50] sm:$0xff] %v4201_v6  ;;  %v4196_v16 = vmul.f32 %v4118_v14, %v6850_v55 }
 0x242   :  { %v4202_v17 = vadd.f32 %v4195_v9, %v3902_v57  ;;  %v4204_v18 = vadd.f32 %v4197_v48, %v3904_v58 }
 0x243   :  { %v4203_v19 = vadd.f32 %v4196_v16, %v3903_v59  ;;  %v4282_v20 = vpop.f32.mrb[46].mxu0  ;;  %v4353_v21 = vpop.f32.mrb[62].mxu1 }
 0x244   :  { %4210 = vst [vmem:[#allocation10 + $0x58] sm:$0xff] %v4202_v17  ;;  %4212 = vst [vmem:[#allocation10 + $0x68] sm:$0xff] %v4204_v18  ;;  %v4499_v27 = vmul.f32 %v4282_v20, %v6665_v10  ;;  %v4501_v22 = vmul.f32 %v4353_v21, %v6667_v11  ;;  %v4284_v28 = vpop.f32.mrb[47].mxu0  ;;  %v4355_v29 = vpop.f32.mrb[63].mxu1 }
 0x245   :  { %4211 = vst [vmem:[#allocation10 + $0x60] sm:$0xff] %v4203_v19  ;;  %v4500_v30 = vmul.f32 %v4284_v28, %v6671_v12  ;;  %v4502_v32 = vmul.f32 %v4355_v29, %v6673_v13 }
 0x247   :  { %v4424_v34 = vpop.f32.mrb[48].mxu0  ;;  %v4495_v39 = vpop.f32.mrb[64].mxu1 }
 0x248   :  { %v4503_v40 = vmul.f32 %v4424_v34, %v6758_v23  ;;  %v4505_v41 = vmul.f32 %v4495_v39, %v6760_v24  ;;  %v4426_v42 = vpop.f32.mrb[49].mxu0  ;;  %v5798_v47 = vpop.f32.mrb[65].mxu1 }
 0x249   :  { %v4504_v49 = vmul.f32 %v4426_v42, %v6764_v25 }
 0x24b   :  { %v4575_v10 = vpop.f32.mrb[50].mxu0  ;;  %v4646_v50 = vpop.f32.mrb[66].mxu1 }
 0x24c   :  { %v4576_v11 = vadd.f32 %v4575_v10, %v4499_v27  ;;  %v4647_v51 = vadd.f32 %v4646_v50, %v4501_v22  ;;  %v4577_v56 = vpop.f32.mrb[51].mxu0  ;;  %v4648_v57 = vpop.f32.mrb[67].mxu1 }
 0x24d   :  { %v4578_v58 = vadd.f32 %v4577_v56, %v4500_v30  ;;  %v4649_v12 = vadd.f32 %v4648_v57, %v4502_v32 }
 0x24f   :  { %v4717_v59 = vpop.f32.mrb[52].mxu0  ;;  %v4788_v13 = vpop.f32.mrb[68].mxu1 }
 0x250   :  { %v4718_v31 = vadd.f32 %v4717_v59, %v4503_v40  ;;  %v4789_v60 = vadd.f32 %v4788_v13, %v4505_v41  ;;  %v4719_v61 = vpop.f32.mrb[53].mxu0  ;;  %v5805_v23 = vpop.f32.mrb[69].mxu1 }
 0x251   :  { %v4720_v62 = vadd.f32 %v4719_v61, %v4504_v49 }
 0x253   :  { %v4861_v24 = vpop.f32.mrb[54].mxu0  ;;  %v4932_v63 = vpop.f32.mrb[70].mxu1 }
 0x254   :  { %v5078_v0 = vmul.f32 %v4861_v24, %v6766_v26  ;;  %v5080_v25 = vmul.f32 %v4932_v63, %v6832_v37  ;;  %v4863_v1 = vpop.f32.mrb[55].mxu0  ;;  %v4934_v2 = vpop.f32.mrb[71].mxu1 }
 0x255   :  { %v5079_v3 = vmul.f32 %v4863_v1, %v6828_v35  ;;  %v5081_v4 = vmul.f32 %v4934_v2, %v6830_v36 }
 0x256   :  { %v5085_v5 = vadd.f32 %v5078_v0, %v4576_v11  ;;  %v5087_v6 = vadd.f32 %v5080_v25, %v4647_v51 }
 0x257   :  { %v5086_v7 = vadd.f32 %v5079_v3, %v4578_v58  ;;  %v5088_v8 = vadd.f32 %v5081_v4, %v4649_v12  ;;  %v5003_v9 = vpop.f32.mrb[56].mxu0  ;;  %v5074_v48 = vpop.f32.mrb[72].mxu1 }
 0x258   :  { %v5082_v14 = vmul.f32 %v5003_v9, %v6834_v38  ;;  %v5084_v15 = vmul.f32 %v5074_v48, %v6840_v45  ;;  %v5005_v16 = vpop.f32.mrb[57].mxu0  ;;  %v5812_v26 = vpop.f32.mrb[73].mxu1 }
 0x259   :  { %v5083_v37 = vmul.f32 %v5005_v16, %v6836_v43 }
 0x25a   :  { %v5089_v17 = vadd.f32 %v5082_v14, %v4718_v31  ;;  %v5091_v18 = vadd.f32 %v5084_v15, %v4789_v60 }
 0x25b   :  { %v5090_v19 = vadd.f32 %v5083_v37, %v4720_v62  ;;  %v5161_v35 = vpop.f32.mrb[58].mxu0  ;;  %v5232_v20 = vpop.f32.mrb[74].mxu1 }
 0x25c   :  { %v5378_v36 = vmul.f32 %v5161_v35, %v6838_v44  ;;  %v5380_v21 = vmul.f32 %v5232_v20, %v6844_v52  ;;  %v5163_v27 = vpop.f32.mrb[59].mxu0  ;;  %v5234_v22 = vpop.f32.mrb[75].mxu1 }
 0x25d   :  { %v5379_v28 = vmul.f32 %v5163_v27, %v6842_v46  ;;  %v5381_v38 = vmul.f32 %v5234_v22, %v6848_v54 }
 0x25e   :  { %v5385_v45 = vadd.f32 %v5378_v36, %v5085_v5  ;;  %v5387_v29 = vadd.f32 %v5380_v21, %v5087_v6 }
 0x25f   :  { %v5386_v30 = vadd.f32 %v5379_v28, %v5086_v7  ;;  %v5388_v32 = vadd.f32 %v5381_v38, %v5088_v8  ;;  %v5303_v43 = vpop.f32.mrb[60].mxu0  ;;  %v5374_v34 = vpop.f32.mrb[76].mxu1 }
 0x260   :  { %5393 = vst [vmem:[#allocation10 + $0x70] sm:$0xff] %v5385_v45  ;;  %5395 = vst [vmem:[#allocation10 + $0x80] sm:$0xff] %v5387_v29  ;;  %v5382_v39 = vmul.f32 %v5303_v43, %v6846_v53  ;;  %v5384_v44 = vmul.f32 %v5374_v34, %v6859_v33  ;;  %v5305_v40 = vpop.f32.mrb[61].mxu0  ;;  %v5819_v52 = vpop.f32.mrb[77].mxu1 }
 0x261   :  { %5394 = vst [vmem:[#allocation10 + $0x78] sm:$0xff] %v5386_v30  ;;  %5396 = vst [vmem:[#allocation10 + $0x88] sm:$0xff] %v5388_v32  ;;  %v5383_v46 = vmul.f32 %v5305_v40, %v6850_v55 }
 0x262   :  { %v5389_v54 = vadd.f32 %v5382_v39, %v5089_v17  ;;  %v5391_v41 = vadd.f32 %v5384_v44, %v5091_v18 }
 0x263   :  { %v5390_v42 = vadd.f32 %v5383_v46, %v5090_v19 }
 0x264   :  { %5397 = vst [vmem:[#allocation10 + $0x90] sm:$0xff] %v5389_v54  ;;  %5399 = vst [vmem:[#allocation10 + $0xa0] sm:$0xff] %v5391_v41 }
 0x265   :  { %5398 = vst [vmem:[#allocation10 + $0x98] sm:$0xff] %v5390_v42 }
 0x266   :  { %6416 = shalt.err (!%p6413_p8)
}
 0x267   :  { %s6417_s17 = scalar_lea.hbm %s6936_s4, 2688 }
 0x268   :  { %p6418_p9 = scmp.ne.s32.totalorder %s6936_s4, %s6417_s17  ;;  %p6421_p10 = scmp.lt.u32.totalorder %s6417_s17, %s6936_s4 }
 0x26a   :  { %p6423_p11 = pnand %p6421_p10, %p6418_p9 }
 0x26c   :  { %6426 = shalt.err (!%p6423_p11)
}
 0x26d   :  { %5411 = dma.vmem_to_hbm [thread:$0]  %s5406_s1, 2688, %s6936_s4, [#allocation4], %s6443_s2, %s6443_s2, %s6444_s6  }
 0x26e   :  { %6433 = dma.done.wait [#allocation4], 2688  }
 0x26f   :  { %6434 = vsyncadd [#allocation4], 4294964608 }
 0x270   :  { %5415 = vsyncpa [#allocation3], 1 }
 0x271   :  { %5416 = vsyncpa [#allocation6], 1 }
 0x272   :  { %5417 = vsyncpa [#allocation9], 1 }
 0x273   :  { %5418 = vsyncpa [#allocation4], 1 }

</bundles_post_ra>
